<compile_context>
chip_gen: v6e
topology: v6e:2x2x1
jax: 0.10.0
libtpu: 0.0.40
codegen_flags: <defaults>
</compile_context>

<pallas_src>
import functools

import jax
import jax.numpy as jnp
from jax import lax
from jax.experimental import pallas as pl
from jax.experimental.pallas import tpu as pltpu


def _layer_norm(x, g, b, eps=1e-5):
    # PyTorch nn.LayerNorm semantics: biased variance over last dim, eps inside sqrt.
    mu = jnp.mean(x, axis=-1, keepdims=True)
    var = jnp.mean((x - mu) ** 2, axis=-1, keepdims=True)
    return (x - mu) * lax.rsqrt(var + eps) * g + b


def _gelu_exact(x):
    # PyTorch nn.GELU() default = exact erf formulation.
    return 0.5 * x * (1.0 + lax.erf(x * 0.7071067811865475))


def joint_cross_attn_kernel(x_ref, ctx_ref,
                            lnx_g, lnx_b, lnc_g, lnc_b,
                            wq, wkv, wo, bo,
                            lnf_g, lnf_b, w1, b1, w2, b2,
                            out_ref,
                            q3_s, k3_s, v3_s, o_s,
                            *, heads, dim_head, scale):
    f32 = jnp.float32
    bf16 = jnp.bfloat16
    inner = heads * dim_head

    x = x_ref[...].astype(f32)       # (TN, D)
    ctx = ctx_ref[...].astype(f32)   # (M,  C)

    # --- CrossAttention ---------------------------------------------------------------
    xn = _layer_norm(x, lnx_g[...], lnx_b[...]).astype(bf16)
    cn = _layer_norm(ctx, lnc_g[...], lnc_b[...]).astype(bf16)

    # projections: bf16 operands, f32 accumulation on the MXU; K/V fused into one matmul.
    q = jnp.dot(xn, wq[...], preferred_element_type=f32) * scale      # (TN, inner)
    kv = jnp.dot(cn, wkv[...], preferred_element_type=f32)            # (M, 2*inner)
    k = kv[:, :inner]
    v = kv[:, inner:]

    # Stage q/k/v in head-major (H, rows, Dh) VMEM scratch so attention runs as ONE
    # head-batched matmul pair instead of H narrow matmuls + lane concatenates.
    for h in range(heads):
        sl = slice(h * dim_head, (h + 1) * dim_head)
        q3_s[h] = q[:, sl].astype(bf16)
        k3_s[h] = k[:, sl].astype(bf16)
        v3_s[h] = v[:, sl].astype(bf16)

    q3 = q3_s[...]                                                    # (H, TN, Dh) bf16
    k3 = k3_s[...]                                                    # (H, M,  Dh) bf16
    v3 = v3_s[...]                                                    # (H, M,  Dh) bf16

    # scores: batched over heads, contract Dh of both sides (no explicit transpose)
    sim = lax.dot_general(q3, k3, (((2,), (2,)), ((0,), (0,))),
                          preferred_element_type=f32)                 # (H, TN, M)
    sim = sim - jnp.max(sim, axis=-1, keepdims=True)
    p = jnp.exp(sim)
    attn = p * pl.reciprocal(jnp.sum(p, axis=-1, keepdims=True), approx=True)

    o3 = lax.dot_general(attn.astype(bf16), v3, (((2,), (1,)), ((0,), (0,))),
                         preferred_element_type=f32)                  # (H, TN, Dh)

    # merge heads back to (TN, inner) through VMEM scratch (matches 'b h n d -> b n (h d)')
    for h in range(heads):
        o_s[:, h * dim_head:(h + 1) * dim_head] = o3[h]

    attn_out = jnp.dot(o_s[...].astype(bf16), wo[...],
                       preferred_element_type=f32) + bo[...]          # (TN, D)

    # residual 1
    x1 = x + attn_out

    # --- FeedForward ------------------------------------------------------------------
    xf = _layer_norm(x1, lnf_g[...], lnf_b[...]).astype(bf16)
    h1 = jnp.dot(xf, w1[...], preferred_element_type=f32) + b1[...]
    h1 = _gelu_exact(h1).astype(bf16)
    ff = jnp.dot(h1, w2[...], preferred_element_type=f32) + b2[...]

    # residual 2
    out_ref[...] = (ff + x1).astype(out_ref.dtype)


def joint_cross_attention_block(x, context, params, *, heads, dim_head, max_tn=512):
    B, N, D = x.shape
    _, M, C = context.shape
    inner = heads * dim_head
    hidden = params["w1"].shape[1]
    scale = float(dim_head) ** -0.5

    # tile the query sequence; keep context + weights resident per tile
    TN = N if N <= max_tn else max_tn
    n_tiles = pl.cdiv(N, TN)

    bf16 = jnp.bfloat16
    wq = params["wq"].astype(bf16)
    wkv = params["wkv"].astype(bf16)
    wo = params["wo"].astype(bf16)
    w1 = params["w1"].astype(bf16)
    w2 = params["w2"].astype(bf16)

    def wspec(shape):
        # weights are grid-invariant: same block for every (b, n) grid point
        return pl.BlockSpec(shape, lambda b, n, _nd=len(shape): (0,) * _nd)

    kernel = functools.partial(joint_cross_attn_kernel,
                               heads=heads, dim_head=dim_head, scale=scale)

    # ---- explicit VMEM budget (weights are double-buffered by default) ----
    def nbytes(a):
        return a.size * a.dtype.itemsize

    weight_bytes = sum(nbytes(a) for a in (
        wq, wkv, wo, w1, w2,
        params["lnx_g"], params["lnx_b"], params["lnc_g"], params["lnc_b"],
        params["bo"], params["lnf_g"], params["lnf_b"], params["b1"], params["b2"]))
    act_bytes = 4 * (TN * D + M * C + TN * D)                        # x / context / out blocks
    scratch_bytes = 2 * heads * dim_head * (TN + 2 * M) + 4 * TN * inner
    interm_bytes = 4 * (TN * (inner + hidden) + 2 * M * inner + heads * TN * M)
    est = 2 * (weight_bytes + act_bytes) + scratch_bytes + interm_bytes + (8 << 20)
    vmem_limit = int(min(max(est, 32 << 20), 64 << 20))

    flops = 2 * B * (N * D * inner + M * C * 2 * inner
                     + 2 * heads * N * M * dim_head
                     + N * inner * D + 2 * N * D * hidden)
    transcendentals = B * (heads * N * M + N * hidden)
    bytes_accessed = int(2 * nbytes(x) + nbytes(context) + weight_bytes)

    return pl.pallas_call(
        kernel,
        out_shape=jax.ShapeDtypeStruct((B, N, D), x.dtype),
        grid=(B, n_tiles),
        in_specs=[
            pl.BlockSpec((pl.Squeezed(), TN, D), lambda b, n: (b, n, 0)),   # x tile
            pl.BlockSpec((pl.Squeezed(), M, C), lambda b, n: (b, 0, 0)),    # full context
            wspec((1, D)), wspec((1, D)),              # attn.norm gamma/beta
            wspec((1, C)), wspec((1, C)),              # attn.context_norm gamma/beta
            wspec((D, inner)),                         # to_q
            wspec((C, 2 * inner)),                     # fused to_kv
            wspec((inner, D)), wspec((1, D)),          # to_out weight / bias
            wspec((1, D)), wspec((1, D)),              # ff LayerNorm gamma/beta
            wspec((D, hidden)), wspec((1, hidden)),    # ff Linear1
            wspec((hidden, D)), wspec((1, D)),         # ff Linear2
        ],
        out_specs=pl.BlockSpec((pl.Squeezed(), TN, D), lambda b, n: (b, n, 0)),
        scratch_shapes=[
            pltpu.VMEM((heads, TN, dim_head), bf16),      # q, head-major
            pltpu.VMEM((heads, M, dim_head), bf16),       # k, head-major
            pltpu.VMEM((heads, M, dim_head), bf16),       # v, head-major
            pltpu.VMEM((TN, inner), jnp.float32),         # merged attention output
        ],
        compiler_params=pltpu.CompilerParams(
            dimension_semantics=("parallel", "parallel"),
            vmem_limit_bytes=vmem_limit),
        cost_estimate=pl.CostEstimate(flops=flops,
                                      transcendentals=transcendentals,
                                      bytes_accessed=bytes_accessed),
    )(x, context,
      params["lnx_g"], params["lnx_b"], params["lnc_g"], params["lnc_b"],
      wq, wkv, wo, params["bo"],
      params["lnf_g"], params["lnf_b"],
      w1, params["b1"], w2, params["b2"])


# ---------------- pure-JAX reference (mirrors the PyTorch forward, full f32) ----------------
def reference_forward(x, context, params, *, heads, dim_head):
    scale = dim_head ** -0.5
    inner = heads * dim_head
    xn = _layer_norm(x, params["lnx_g"], params["lnx_b"])
    cn = _layer_norm(context, params["lnc_g"], params["lnc_b"])
    q = jnp.einsum("bnd,de->bne", xn, params["wq"]) * scale
    kv = jnp.einsum("bmc,ce->bme", cn, params["wkv"])
    k, v = kv[..., :inner], kv[..., inner:]
    B, N, _ = q.shape
    M = k.shape[1]
    q = q.reshape(B, N, heads, dim_head).transpose(0, 2, 1, 3)
    k = k.reshape(B, M, heads, dim_head).transpose(0, 2, 1, 3)
    v = v.reshape(B, M, heads, dim_head).transpose(0, 2, 1, 3)
    sim = jnp.einsum("bhid,bhjd->bhij", q, k)
    attn = jax.nn.softmax(sim, axis=-1)
    o = jnp.einsum("bhij,bhjd->bhid", attn, v)
    o = o.transpose(0, 2, 1, 3).reshape(B, N, inner)
    attn_out = jnp.einsum("bne,ed->bnd", o, params["wo"]) + params["bo"]
    x1 = x + attn_out
    xf = _layer_norm(x1, params["lnf_g"], params["lnf_b"])
    h1 = _gelu_exact(jnp.einsum("bnd,dh->bnh", xf, params["w1"]) + params["b1"])
    ff = jnp.einsum("bnh,hd->bnd", h1, params["w2"]) + params["b2"]
    return ff + x1


if __name__ == "__main__":
    # small shapes consistent with the module (lane-dense: D = C = inner = 128, hidden = 512)
    B, N, M = 2, 8, 8
    D, C = 128, 128
    heads, dim_head = 2, 64
    ff_mult = 4
    inner = heads * dim_head
    hidden = D * ff_mult

    key = jax.random.PRNGKey(0)
    ks = jax.random.split(key, 16)

    def rnd(k, shape, s=0.05):
        return jax.random.normal(k, shape, jnp.float32) * s

    params = {
        "lnx_g": 1.0 + rnd(ks[0], (1, D)), "lnx_b": rnd(ks[1], (1, D)),
        "lnc_g": 1.0 + rnd(ks[2], (1, C)), "lnc_b": rnd(ks[3], (1, C)),
        "wq": rnd(ks[4], (D, inner)),
        "wkv": rnd(ks[5], (C, 2 * inner)),
        "wo": rnd(ks[6], (inner, D)), "bo": rnd(ks[7], (1, D)),
        "lnf_g": 1.0 + rnd(ks[8], (1, D)), "lnf_b": rnd(ks[9], (1, D)),
        "w1": rnd(ks[10], (D, hidden)), "b1": rnd(ks[11], (1, hidden)),
        "w2": rnd(ks[12], (hidden, D)), "b2": rnd(ks[13], (1, D)),
    }

    kx, kc = jax.random.split(ks[14])
    x = jax.random.normal(kx, (B, N, D), jnp.float32)
    context = jax.random.normal(kc, (B, M, C), jnp.float32)

    out = joint_cross_attention_block(x, context, params, heads=heads, dim_head=dim_head)
    out = jax.block_until_ready(out)

    ref = reference_forward(x, context, params, heads=heads, dim_head=dim_head)
    assert out.shape == (B, N, D)
    max_err = float(jnp.max(jnp.abs(out - ref)))
    # bf16 matmul operands (f32 accumulation) -> slightly looser tolerance than pure-f32
    assert jnp.allclose(out, ref, atol=3e-2, rtol=3e-2), f"max abs err {max_err}"

    print("KERNEL_OK")
</pallas_src>

<mosaic_0001>
module attributes {stable_mosaic.version = 11 : i64} {
  func.func @joint_cross_attn_kernel(%arg0: i32, %arg1: i32, %arg2: memref<1x8x128xf32, #tpu.memory_space<vmem>>, %arg3: memref<1x8x128xf32, #tpu.memory_space<vmem>>, %arg4: memref<1x128xf32, #tpu.memory_space<vmem>>, %arg5: memref<1x128xf32, #tpu.memory_space<vmem>>, %arg6: memref<1x128xf32, #tpu.memory_space<vmem>>, %arg7: memref<1x128xf32, #tpu.memory_space<vmem>>, %arg8: memref<128x128xbf16, #tpu.memory_space<vmem>>, %arg9: memref<128x256xbf16, #tpu.memory_space<vmem>>, %arg10: memref<128x128xbf16, #tpu.memory_space<vmem>>, %arg11: memref<1x128xf32, #tpu.memory_space<vmem>>, %arg12: memref<1x128xf32, #tpu.memory_space<vmem>>, %arg13: memref<1x128xf32, #tpu.memory_space<vmem>>, %arg14: memref<128x512xbf16, #tpu.memory_space<vmem>>, %arg15: memref<1x512xf32, #tpu.memory_space<vmem>>, %arg16: memref<512x128xbf16, #tpu.memory_space<vmem>>, %arg17: memref<1x128xf32, #tpu.memory_space<vmem>>, %arg18: memref<1x8x128xf32, #tpu.memory_space<vmem>>, %arg19: memref<2x8x64xbf16, #tpu.memory_space<vmem>>, %arg20: memref<2x8x64xbf16, #tpu.memory_space<vmem>>, %arg21: memref<2x8x64xbf16, #tpu.memory_space<vmem>>, %arg22: memref<8x128xf32, #tpu.memory_space<vmem>>) attributes {dimension_semantics = [#tpu.dimension_semantics<parallel>, #tpu.dimension_semantics<parallel>], iteration_bounds = array<i64: 2, 1>, scalar_prefetch = 0 : i64, scratch_operands = 4 : i64, tpu.core_type = #tpu.core_type<tc>, window_params = [{transform_indices = @transform_0, window_bounds = array<i64: 1, 8, 128>}, {transform_indices = @transform_1, window_bounds = array<i64: 1, 8, 128>}, {pipeline_mode = #tpu.pipeline_mode<synchronous>, transform_indices = @transform_2, window_bounds = array<i64: 1, 128>}, {pipeline_mode = #tpu.pipeline_mode<synchronous>, transform_indices = @transform_3, window_bounds = array<i64: 1, 128>}, {pipeline_mode = #tpu.pipeline_mode<synchronous>, transform_indices = @transform_4, window_bounds = array<i64: 1, 128>}, {pipeline_mode = #tpu.pipeline_mode<synchronous>, transform_indices = @transform_5, window_bounds = array<i64: 1, 128>}, {pipeline_mode = #tpu.pipeline_mode<synchronous>, transform_indices = @transform_6, window_bounds = array<i64: 128, 128>}, {pipeline_mode = #tpu.pipeline_mode<synchronous>, transform_indices = @transform_7, window_bounds = array<i64: 128, 256>}, {pipeline_mode = #tpu.pipeline_mode<synchronous>, transform_indices = @transform_8, window_bounds = array<i64: 128, 128>}, {pipeline_mode = #tpu.pipeline_mode<synchronous>, transform_indices = @transform_9, window_bounds = array<i64: 1, 128>}, {pipeline_mode = #tpu.pipeline_mode<synchronous>, transform_indices = @transform_10, window_bounds = array<i64: 1, 128>}, {pipeline_mode = #tpu.pipeline_mode<synchronous>, transform_indices = @transform_11, window_bounds = array<i64: 1, 128>}, {pipeline_mode = #tpu.pipeline_mode<synchronous>, transform_indices = @transform_12, window_bounds = array<i64: 128, 512>}, {pipeline_mode = #tpu.pipeline_mode<synchronous>, transform_indices = @transform_13, window_bounds = array<i64: 1, 512>}, {pipeline_mode = #tpu.pipeline_mode<synchronous>, transform_indices = @transform_14, window_bounds = array<i64: 512, 128>}, {pipeline_mode = #tpu.pipeline_mode<synchronous>, transform_indices = @transform_15, window_bounds = array<i64: 1, 128>}, {transform_indices = @transform_16, window_bounds = array<i64: 1, 8, 128>}]} {
    %c0 = arith.constant 0 : index
    %c0_0 = arith.constant 0 : index
    %c0_1 = arith.constant 0 : index
    %0 = vector.load %arg2[%c0, %c0_0, %c0_1] : memref<1x8x128xf32, #tpu.memory_space<vmem>>, vector<1x8x128xf32>
    %1 = vector.shape_cast %0 : vector<1x8x128xf32> to vector<8x128xf32>
    %c0_2 = arith.constant 0 : index
    %c0_3 = arith.constant 0 : index
    %c0_4 = arith.constant 0 : index
    %2 = vector.load %arg3[%c0_2, %c0_3, %c0_4] : memref<1x8x128xf32, #tpu.memory_space<vmem>>, vector<1x8x128xf32>
    %3 = vector.shape_cast %2 : vector<1x8x128xf32> to vector<8x128xf32>
    %c0_5 = arith.constant 0 : index
    %c0_6 = arith.constant 0 : index
    %4 = vector.load %arg4[%c0_5, %c0_6] : memref<1x128xf32, #tpu.memory_space<vmem>>, vector<1x128xf32>
    %c0_7 = arith.constant 0 : index
    %c0_8 = arith.constant 0 : index
    %5 = vector.load %arg5[%c0_7, %c0_8] : memref<1x128xf32, #tpu.memory_space<vmem>>, vector<1x128xf32>
    %cst = arith.constant dense<0.000000e+00> : vector<8xf32>
    %6 = vector.multi_reduction <add>, %1, %cst [1] : vector<8x128xf32> to vector<8xf32>
    %7 = vector.shape_cast %6 : vector<8xf32> to vector<8x1xf32>
    %cst_9 = arith.constant 1.280000e+02 : f32
    %8 = vector.broadcast %cst_9 : f32 to vector<8x1xf32>
    %9 = arith.divf %7, %8 : vector<8x1xf32>
    %10 = vector.broadcast %9 : vector<8x1xf32> to vector<8x128xf32>
    %11 = arith.subf %1, %10 : vector<8x128xf32>
    %12 = arith.mulf %11, %11 : vector<8x128xf32>
    %cst_10 = arith.constant dense<0.000000e+00> : vector<8xf32>
    %13 = vector.multi_reduction <add>, %12, %cst_10 [1] : vector<8x128xf32> to vector<8xf32>
    %14 = vector.shape_cast %13 : vector<8xf32> to vector<8x1xf32>
    %cst_11 = arith.constant 1.280000e+02 : f32
    %15 = vector.broadcast %cst_11 : f32 to vector<8x1xf32>
    %16 = arith.divf %14, %15 : vector<8x1xf32>
    %17 = vector.broadcast %9 : vector<8x1xf32> to vector<8x128xf32>
    %18 = arith.subf %1, %17 : vector<8x128xf32>
    %cst_12 = arith.constant 9.99999974E-6 : f32
    %19 = vector.broadcast %cst_12 : f32 to vector<8x1xf32>
    %20 = arith.addf %16, %19 : vector<8x1xf32>
    %21 = math.rsqrt %20 : vector<8x1xf32>
    %22 = vector.broadcast %21 : vector<8x1xf32> to vector<8x128xf32>
    %23 = arith.mulf %18, %22 : vector<8x128xf32>
    %24 = vector.broadcast %4 : vector<1x128xf32> to vector<8x128xf32>
    %25 = arith.mulf %23, %24 : vector<8x128xf32>
    %26 = vector.broadcast %5 : vector<1x128xf32> to vector<8x128xf32>
    %27 = arith.addf %25, %26 : vector<8x128xf32>
    %28 = arith.truncf %27 : vector<8x128xf32> to vector<8x128xbf16>
    %c0_13 = arith.constant 0 : index
    %c0_14 = arith.constant 0 : index
    %29 = vector.load %arg6[%c0_13, %c0_14] : memref<1x128xf32, #tpu.memory_space<vmem>>, vector<1x128xf32>
    %c0_15 = arith.constant 0 : index
    %c0_16 = arith.constant 0 : index
    %30 = vector.load %arg7[%c0_15, %c0_16] : memref<1x128xf32, #tpu.memory_space<vmem>>, vector<1x128xf32>
    %cst_17 = arith.constant dense<0.000000e+00> : vector<8xf32>
    %31 = vector.multi_reduction <add>, %3, %cst_17 [1] : vector<8x128xf32> to vector<8xf32>
    %32 = vector.shape_cast %31 : vector<8xf32> to vector<8x1xf32>
    %cst_18 = arith.constant 1.280000e+02 : f32
    %33 = vector.broadcast %cst_18 : f32 to vector<8x1xf32>
    %34 = arith.divf %32, %33 : vector<8x1xf32>
    %35 = vector.broadcast %34 : vector<8x1xf32> to vector<8x128xf32>
    %36 = arith.subf %3, %35 : vector<8x128xf32>
    %37 = arith.mulf %36, %36 : vector<8x128xf32>
    %cst_19 = arith.constant dense<0.000000e+00> : vector<8xf32>
    %38 = vector.multi_reduction <add>, %37, %cst_19 [1] : vector<8x128xf32> to vector<8xf32>
    %39 = vector.shape_cast %38 : vector<8xf32> to vector<8x1xf32>
    %cst_20 = arith.constant 1.280000e+02 : f32
    %40 = vector.broadcast %cst_20 : f32 to vector<8x1xf32>
    %41 = arith.divf %39, %40 : vector<8x1xf32>
    %42 = vector.broadcast %34 : vector<8x1xf32> to vector<8x128xf32>
    %43 = arith.subf %3, %42 : vector<8x128xf32>
    %cst_21 = arith.constant 9.99999974E-6 : f32
    %44 = vector.broadcast %cst_21 : f32 to vector<8x1xf32>
    %45 = arith.addf %41, %44 : vector<8x1xf32>
    %46 = math.rsqrt %45 : vector<8x1xf32>
    %47 = vector.broadcast %46 : vector<8x1xf32> to vector<8x128xf32>
    %48 = arith.mulf %43, %47 : vector<8x128xf32>
    %49 = vector.broadcast %29 : vector<1x128xf32> to vector<8x128xf32>
    %50 = arith.mulf %48, %49 : vector<8x128xf32>
    %51 = vector.broadcast %30 : vector<1x128xf32> to vector<8x128xf32>
    %52 = arith.addf %50, %51 : vector<8x128xf32>
    %53 = arith.truncf %52 : vector<8x128xf32> to vector<8x128xbf16>
    %c0_22 = arith.constant 0 : index
    %c0_23 = arith.constant 0 : index
    %54 = vector.load %arg8[%c0_22, %c0_23] : memref<128x128xbf16, #tpu.memory_space<vmem>>, vector<128x128xbf16>
    %cst_24 = arith.constant dense<0.000000e+00> : vector<8x128xf32>
    %55 = tpu.matmul %28, %54, %cst_24 {dimension_numbers = #tpu.dot_dimension_numbers<[1], [0], [0], [1], [0, 0, 1, 1], [], []>} : vector<8x128xbf16>, vector<128x128xbf16>, vector<8x128xf32> -> vector<8x128xf32>
    %cst_25 = arith.constant 1.250000e-01 : f32
    %56 = vector.broadcast %cst_25 : f32 to vector<8x128xf32>
    %57 = arith.mulf %55, %56 : vector<8x128xf32>
    %c0_26 = arith.constant 0 : index
    %c0_27 = arith.constant 0 : index
    %58 = vector.load %arg9[%c0_26, %c0_27] : memref<128x256xbf16, #tpu.memory_space<vmem>>, vector<128x256xbf16>
    %cst_28 = arith.constant dense<0.000000e+00> : vector<8x256xf32>
    %59 = tpu.matmul %53, %58, %cst_28 {dimension_numbers = #tpu.dot_dimension_numbers<[1], [0], [0], [1], [0, 0, 1, 1], [], []>} : vector<8x128xbf16>, vector<128x256xbf16>, vector<8x256xf32> -> vector<8x256xf32>
    %60 = vector.extract_strided_slice %59 {offsets = [0, 0], sizes = [8, 128], strides = [1, 1]} : vector<8x256xf32> to vector<8x128xf32>
    %61 = vector.extract_strided_slice %59 {offsets = [0, 128], sizes = [8, 128], strides = [1, 1]} : vector<8x256xf32> to vector<8x128xf32>
    %62 = vector.extract_strided_slice %57 {offsets = [0, 0], sizes = [8, 64], strides = [1, 1]} : vector<8x128xf32> to vector<8x64xf32>
    %63 = arith.truncf %62 : vector<8x64xf32> to vector<8x64xbf16>
    %c0_29 = arith.constant 0 : index
    %c0_30 = arith.constant 0 : index
    %c0_31 = arith.constant 0 : index
    %64 = vector.load %arg19[%c0_29, %c0_30, %c0_31] : memref<2x8x64xbf16, #tpu.memory_space<vmem>>, vector<1x8x64xbf16>
    %65 = vector.shape_cast %64 : vector<1x8x64xbf16> to vector<8x64xbf16>
    %66 = vector.shape_cast %63 : vector<8x64xbf16> to vector<1x8x64xbf16>
    tpu.vector_store %arg19[%c0_29, %c0_30, %c0_31], %66 {strides = array<i32>} : memref<2x8x64xbf16, #tpu.memory_space<vmem>>, vector<1x8x64xbf16>,
    %67 = vector.extract_strided_slice %60 {offsets = [0, 0], sizes = [8, 64], strides = [1, 1]} : vector<8x128xf32> to vector<8x64xf32>
    %68 = arith.truncf %67 : vector<8x64xf32> to vector<8x64xbf16>
    %c0_32 = arith.constant 0 : index
    %c0_33 = arith.constant 0 : index
    %c0_34 = arith.constant 0 : index
    %69 = vector.load %arg20[%c0_32, %c0_33, %c0_34] : memref<2x8x64xbf16, #tpu.memory_space<vmem>>, vector<1x8x64xbf16>
    %70 = vector.shape_cast %69 : vector<1x8x64xbf16> to vector<8x64xbf16>
    %71 = vector.shape_cast %68 : vector<8x64xbf16> to vector<1x8x64xbf16>
    tpu.vector_store %arg20[%c0_32, %c0_33, %c0_34], %71 {strides = array<i32>} : memref<2x8x64xbf16, #tpu.memory_space<vmem>>, vector<1x8x64xbf16>,
    %72 = vector.extract_strided_slice %61 {offsets = [0, 0], sizes = [8, 64], strides = [1, 1]} : vector<8x128xf32> to vector<8x64xf32>
    %73 = arith.truncf %72 : vector<8x64xf32> to vector<8x64xbf16>
    %c0_35 = arith.constant 0 : index
    %c0_36 = arith.constant 0 : index
    %c0_37 = arith.constant 0 : index
    %74 = vector.load %arg21[%c0_35, %c0_36, %c0_37] : memref<2x8x64xbf16, #tpu.memory_space<vmem>>, vector<1x8x64xbf16>
    %75 = vector.shape_cast %74 : vector<1x8x64xbf16> to vector<8x64xbf16>
    %76 = vector.shape_cast %73 : vector<8x64xbf16> to vector<1x8x64xbf16>
    tpu.vector_store %arg21[%c0_35, %c0_36, %c0_37], %76 {strides = array<i32>} : memref<2x8x64xbf16, #tpu.memory_space<vmem>>, vector<1x8x64xbf16>,
    %77 = vector.extract_strided_slice %57 {offsets = [0, 64], sizes = [8, 64], strides = [1, 1]} : vector<8x128xf32> to vector<8x64xf32>
    %78 = arith.truncf %77 : vector<8x64xf32> to vector<8x64xbf16>
    %c1 = arith.constant 1 : index
    %c0_38 = arith.constant 0 : index
    %c0_39 = arith.constant 0 : index
    %79 = vector.load %arg19[%c1, %c0_38, %c0_39] : memref<2x8x64xbf16, #tpu.memory_space<vmem>>, vector<1x8x64xbf16>
    %80 = vector.shape_cast %79 : vector<1x8x64xbf16> to vector<8x64xbf16>
    %81 = vector.shape_cast %78 : vector<8x64xbf16> to vector<1x8x64xbf16>
    tpu.vector_store %arg19[%c1, %c0_38, %c0_39], %81 {strides = array<i32>} : memref<2x8x64xbf16, #tpu.memory_space<vmem>>, vector<1x8x64xbf16>,
    %82 = vector.extract_strided_slice %60 {offsets = [0, 64], sizes = [8, 64], strides = [1, 1]} : vector<8x128xf32> to vector<8x64xf32>
    %83 = arith.truncf %82 : vector<8x64xf32> to vector<8x64xbf16>
    %c1_40 = arith.constant 1 : index
    %c0_41 = arith.constant 0 : index
    %c0_42 = arith.constant 0 : index
    %84 = vector.load %arg20[%c1_40, %c0_41, %c0_42] : memref<2x8x64xbf16, #tpu.memory_space<vmem>>, vector<1x8x64xbf16>
    %85 = vector.shape_cast %84 : vector<1x8x64xbf16> to vector<8x64xbf16>
    %86 = vector.shape_cast %83 : vector<8x64xbf16> to vector<1x8x64xbf16>
    tpu.vector_store %arg20[%c1_40, %c0_41, %c0_42], %86 {strides = array<i32>} : memref<2x8x64xbf16, #tpu.memory_space<vmem>>, vector<1x8x64xbf16>,
    %87 = vector.extract_strided_slice %61 {offsets = [0, 64], sizes = [8, 64], strides = [1, 1]} : vector<8x128xf32> to vector<8x64xf32>
    %88 = arith.truncf %87 : vector<8x64xf32> to vector<8x64xbf16>
    %c1_43 = arith.constant 1 : index
    %c0_44 = arith.constant 0 : index
    %c0_45 = arith.constant 0 : index
    %89 = vector.load %arg21[%c1_43, %c0_44, %c0_45] : memref<2x8x64xbf16, #tpu.memory_space<vmem>>, vector<1x8x64xbf16>
    %90 = vector.shape_cast %89 : vector<1x8x64xbf16> to vector<8x64xbf16>
    %91 = vector.shape_cast %88 : vector<8x64xbf16> to vector<1x8x64xbf16>
    tpu.vector_store %arg21[%c1_43, %c0_44, %c0_45], %91 {strides = array<i32>} : memref<2x8x64xbf16, #tpu.memory_space<vmem>>, vector<1x8x64xbf16>,
    %c0_46 = arith.constant 0 : index
    %c0_47 = arith.constant 0 : index
    %c0_48 = arith.constant 0 : index
    %92 = vector.load %arg19[%c0_46, %c0_47, %c0_48] : memref<2x8x64xbf16, #tpu.memory_space<vmem>>, vector<2x8x64xbf16>
    %c0_49 = arith.constant 0 : index
    %c0_50 = arith.constant 0 : index
    %c0_51 = arith.constant 0 : index
    %93 = vector.load %arg20[%c0_49, %c0_50, %c0_51] : memref<2x8x64xbf16, #tpu.memory_space<vmem>>, vector<2x8x64xbf16>
    %c0_52 = arith.constant 0 : index
    %c0_53 = arith.constant 0 : index
    %c0_54 = arith.constant 0 : index
    %94 = vector.load %arg21[%c0_52, %c0_53, %c0_54] : memref<2x8x64xbf16, #tpu.memory_space<vmem>>, vector<2x8x64xbf16>
    %cst_55 = arith.constant dense<0.000000e+00> : vector<2x8x8xf32>
    %95 = tpu.matmul %92, %93, %cst_55 {dimension_numbers = #tpu.dot_dimension_numbers<[2], [2], [1], [1], [0, 0, 0, 1, 1, 1], [0], [0]>} : vector<2x8x64xbf16>, vector<2x8x64xbf16>, vector<2x8x8xf32> -> vector<2x8x8xf32>
    %cst_56 = arith.constant dense<0xFF800000> : vector<2x8xf32>
    %96 = vector.multi_reduction <maximumf>, %95, %cst_56 [2] : vector<2x8x8xf32> to vector<2x8xf32>
    %97 = vector.shape_cast %96 : vector<2x8xf32> to vector<2x8x1xf32>
    %98 = vector.broadcast %97 : vector<2x8x1xf32> to vector<2x8x8xf32>
    %99 = arith.subf %95, %98 : vector<2x8x8xf32>
    %100 = math.exp %99 : vector<2x8x8xf32>
    %cst_57 = arith.constant dense<0.000000e+00> : vector<2x8xf32>
    %101 = vector.multi_reduction <add>, %100, %cst_57 [2] : vector<2x8x8xf32> to vector<2x8xf32>
    %102 = vector.shape_cast %101 : vector<2x8xf32> to vector<2x8x1xf32>
    %103 = tpu.reciprocal %102 {approx = true} : vector<2x8x1xf32> -> vector<2x8x1xf32>
    %104 = vector.broadcast %103 : vector<2x8x1xf32> to vector<2x8x8xf32>
    %105 = arith.mulf %100, %104 : vector<2x8x8xf32>
    %106 = arith.truncf %105 : vector<2x8x8xf32> to vector<2x8x8xbf16>
    %cst_58 = arith.constant dense<0.000000e+00> : vector<2x8x64xf32>
    %107 = tpu.matmul %106, %94, %cst_58 {dimension_numbers = #tpu.dot_dimension_numbers<[2], [1], [1], [2], [0, 0, 0, 1, 1, 2], [0], [0]>} : vector<2x8x8xbf16>, vector<2x8x64xbf16>, vector<2x8x64xf32> -> vector<2x8x64xf32>
    %108 = vector.extract_strided_slice %107 {offsets = [0, 0, 0], sizes = [1, 8, 64], strides = [1, 1, 1]} : vector<2x8x64xf32> to vector<1x8x64xf32>
    %109 = vector.shape_cast %108 : vector<1x8x64xf32> to vector<8x64xf32>
    %c0_59 = arith.constant 0 : index
    %c0_60 = arith.constant 0 : index
    %110 = vector.load %arg22[%c0_59, %c0_60] : memref<8x128xf32, #tpu.memory_space<vmem>>, vector<8x64xf32>
    tpu.vector_store %arg22[%c0_59, %c0_60], %109 {strides = array<i32>} : memref<8x128xf32, #tpu.memory_space<vmem>>, vector<8x64xf32>,
    %111 = vector.extract_strided_slice %107 {offsets = [1, 0, 0], sizes = [1, 8, 64], strides = [1, 1, 1]} : vector<2x8x64xf32> to vector<1x8x64xf32>
    %112 = vector.shape_cast %111 : vector<1x8x64xf32> to vector<8x64xf32>
    %c0_61 = arith.constant 0 : index
    %c64 = arith.constant 64 : index
    %113 = vector.load %arg22[%c0_61, %c64] : memref<8x128xf32, #tpu.memory_space<vmem>>, vector<8x64xf32>
    tpu.vector_store %arg22[%c0_61, %c64], %112 {strides = array<i32>} : memref<8x128xf32, #tpu.memory_space<vmem>>, vector<8x64xf32>,
    %c0_62 = arith.constant 0 : index
    %c0_63 = arith.constant 0 : index
    %114 = vector.load %arg22[%c0_62, %c0_63] : memref<8x128xf32, #tpu.memory_space<vmem>>, vector<8x128xf32>
    %115 = arith.truncf %114 : vector<8x128xf32> to vector<8x128xbf16>
    %c0_64 = arith.constant 0 : index
    %c0_65 = arith.constant 0 : index
    %116 = vector.load %arg10[%c0_64, %c0_65] : memref<128x128xbf16, #tpu.memory_space<vmem>>, vector<128x128xbf16>
    %cst_66 = arith.constant dense<0.000000e+00> : vector<8x128xf32>
    %117 = tpu.matmul %115, %116, %cst_66 {dimension_numbers = #tpu.dot_dimension_numbers<[1], [0], [0], [1], [0, 0, 1, 1], [], []>} : vector<8x128xbf16>, vector<128x128xbf16>, vector<8x128xf32> -> vector<8x128xf32>
    %c0_67 = arith.constant 0 : index
    %c0_68 = arith.constant 0 : index
    %118 = vector.load %arg11[%c0_67, %c0_68] : memref<1x128xf32, #tpu.memory_space<vmem>>, vector<1x128xf32>
    %119 = vector.broadcast %118 : vector<1x128xf32> to vector<8x128xf32>
    %120 = arith.addf %117, %119 : vector<8x128xf32>
    %121 = arith.addf %1, %120 : vector<8x128xf32>
    %c0_69 = arith.constant 0 : index
    %c0_70 = arith.constant 0 : index
    %122 = vector.load %arg12[%c0_69, %c0_70] : memref<1x128xf32, #tpu.memory_space<vmem>>, vector<1x128xf32>
    %c0_71 = arith.constant 0 : index
    %c0_72 = arith.constant 0 : index
    %123 = vector.load %arg13[%c0_71, %c0_72] : memref<1x128xf32, #tpu.memory_space<vmem>>, vector<1x128xf32>
    %cst_73 = arith.constant dense<0.000000e+00> : vector<8xf32>
    %124 = vector.multi_reduction <add>, %121, %cst_73 [1] : vector<8x128xf32> to vector<8xf32>
    %125 = vector.shape_cast %124 : vector<8xf32> to vector<8x1xf32>
    %cst_74 = arith.constant 1.280000e+02 : f32
    %126 = vector.broadcast %cst_74 : f32 to vector<8x1xf32>
    %127 = arith.divf %125, %126 : vector<8x1xf32>
    %128 = vector.broadcast %127 : vector<8x1xf32> to vector<8x128xf32>
    %129 = arith.subf %121, %128 : vector<8x128xf32>
    %130 = arith.mulf %129, %129 : vector<8x128xf32>
    %cst_75 = arith.constant dense<0.000000e+00> : vector<8xf32>
    %131 = vector.multi_reduction <add>, %130, %cst_75 [1] : vector<8x128xf32> to vector<8xf32>
    %132 = vector.shape_cast %131 : vector<8xf32> to vector<8x1xf32>
    %cst_76 = arith.constant 1.280000e+02 : f32
    %133 = vector.broadcast %cst_76 : f32 to vector<8x1xf32>
    %134 = arith.divf %132, %133 : vector<8x1xf32>
    %135 = vector.broadcast %127 : vector<8x1xf32> to vector<8x128xf32>
    %136 = arith.subf %121, %135 : vector<8x128xf32>
    %cst_77 = arith.constant 9.99999974E-6 : f32
    %137 = vector.broadcast %cst_77 : f32 to vector<8x1xf32>
    %138 = arith.addf %134, %137 : vector<8x1xf32>
    %139 = math.rsqrt %138 : vector<8x1xf32>
    %140 = vector.broadcast %139 : vector<8x1xf32> to vector<8x128xf32>
    %141 = arith.mulf %136, %140 : vector<8x128xf32>
    %142 = vector.broadcast %122 : vector<1x128xf32> to vector<8x128xf32>
    %143 = arith.mulf %141, %142 : vector<8x128xf32>
    %144 = vector.broadcast %123 : vector<1x128xf32> to vector<8x128xf32>
    %145 = arith.addf %143, %144 : vector<8x128xf32>
    %146 = arith.truncf %145 : vector<8x128xf32> to vector<8x128xbf16>
    %c0_78 = arith.constant 0 : index
    %c0_79 = arith.constant 0 : index
    %147 = vector.load %arg14[%c0_78, %c0_79] : memref<128x512xbf16, #tpu.memory_space<vmem>>, vector<128x512xbf16>
    %cst_80 = arith.constant dense<0.000000e+00> : vector<8x512xf32>
    %148 = tpu.matmul %146, %147, %cst_80 {dimension_numbers = #tpu.dot_dimension_numbers<[1], [0], [0], [1], [0, 0, 1, 1], [], []>} : vector<8x128xbf16>, vector<128x512xbf16>, vector<8x512xf32> -> vector<8x512xf32>
    %c0_81 = arith.constant 0 : index
    %c0_82 = arith.constant 0 : index
    %149 = vector.load %arg15[%c0_81, %c0_82] : memref<1x512xf32, #tpu.memory_space<vmem>>, vector<1x512xf32>
    %150 = vector.broadcast %149 : vector<1x512xf32> to vector<8x512xf32>
    %151 = arith.addf %148, %150 : vector<8x512xf32>
    %cst_83 = arith.constant 5.000000e-01 : f32
    %152 = vector.broadcast %cst_83 : f32 to vector<8x512xf32>
    %153 = arith.mulf %152, %151 : vector<8x512xf32>
    %cst_84 = arith.constant 0.707106769 : f32
    %154 = vector.broadcast %cst_84 : f32 to vector<8x512xf32>
    %155 = arith.mulf %151, %154 : vector<8x512xf32>
    %156 = math.erf %155 : vector<8x512xf32>
    %cst_85 = arith.constant 1.000000e+00 : f32
    %157 = vector.broadcast %cst_85 : f32 to vector<8x512xf32>
    %158 = arith.addf %157, %156 : vector<8x512xf32>
    %159 = arith.mulf %153, %158 : vector<8x512xf32>
    %160 = arith.truncf %159 : vector<8x512xf32> to vector<8x512xbf16>
    %c0_86 = arith.constant 0 : index
    %c0_87 = arith.constant 0 : index
    %161 = vector.load %arg16[%c0_86, %c0_87] : memref<512x128xbf16, #tpu.memory_space<vmem>>, vector<512x128xbf16>
    %cst_88 = arith.constant dense<0.000000e+00> : vector<8x128xf32>
    %162 = tpu.matmul %160, %161, %cst_88 {dimension_numbers = #tpu.dot_dimension_numbers<[1], [0], [0], [1], [0, 0, 1, 1], [], []>} : vector<8x512xbf16>, vector<512x128xbf16>, vector<8x128xf32> -> vector<8x128xf32>
    %c0_89 = arith.constant 0 : index
    %c0_90 = arith.constant 0 : index
    %163 = vector.load %arg17[%c0_89, %c0_90] : memref<1x128xf32, #tpu.memory_space<vmem>>, vector<1x128xf32>
    %164 = vector.broadcast %163 : vector<1x128xf32> to vector<8x128xf32>
    %165 = arith.addf %162, %164 : vector<8x128xf32>
    %166 = arith.addf %165, %121 : vector<8x128xf32>
    %c0_91 = arith.constant 0 : index
    %c0_92 = arith.constant 0 : index
    %c0_93 = arith.constant 0 : index
    %167 = vector.load %arg18[%c0_91, %c0_92, %c0_93] : memref<1x8x128xf32, #tpu.memory_space<vmem>>, vector<1x8x128xf32>
    %168 = vector.shape_cast %167 : vector<1x8x128xf32> to vector<8x128xf32>
    %169 = vector.shape_cast %166 : vector<8x128xf32> to vector<1x8x128xf32>
    tpu.vector_store %arg18[%c0_91, %c0_92, %c0_93], %169 {strides = array<i32>} : memref<1x8x128xf32, #tpu.memory_space<vmem>>, vector<1x8x128xf32>,
    return
  }
  func.func @transform_0(%arg0: i32, %arg1: i32) -> (i32, i32, i32) {
    %c0_i32 = arith.constant 0 : i32
    %c0_i32_0 = arith.constant 0 : i32
    return %arg0, %arg1, %c0_i32 : i32, i32, i32
  }
  func.func @transform_1(%arg0: i32, %arg1: i32) -> (i32, i32, i32) {
    %c0_i32 = arith.constant 0 : i32
    %c0_i32_0 = arith.constant 0 : i32
    %c0_i32_1 = arith.constant 0 : i32
    return %arg0, %c0_i32, %c0_i32_0 : i32, i32, i32
  }
  func.func @transform_2(%arg0: i32, %arg1: i32) -> (i32, i32) {
    %c0_i32 = arith.constant 0 : i32
    %c0_i32_0 = arith.constant 0 : i32
    %c0_i32_1 = arith.constant 0 : i32
    return %c0_i32, %c0_i32_0 : i32, i32
  }
  func.func @transform_3(%arg0: i32, %arg1: i32) -> (i32, i32) {
    %c0_i32 = arith.constant 0 : i32
    %c0_i32_0 = arith.constant 0 : i32
    %c0_i32_1 = arith.constant 0 : i32
    return %c0_i32, %c0_i32_0 : i32, i32
  }
  func.func @transform_4(%arg0: i32, %arg1: i32) -> (i32, i32) {
    %c0_i32 = arith.constant 0 : i32
    %c0_i32_0 = arith.constant 0 : i32
    %c0_i32_1 = arith.constant 0 : i32
    return %c0_i32, %c0_i32_0 : i32, i32
  }
  func.func @transform_5(%arg0: i32, %arg1: i32) -> (i32, i32) {
    %c0_i32 = arith.constant 0 : i32
    %c0_i32_0 = arith.constant 0 : i32
    %c0_i32_1 = arith.constant 0 : i32
    return %c0_i32, %c0_i32_0 : i32, i32
  }
  func.func @transform_6(%arg0: i32, %arg1: i32) -> (i32, i32) {
    %c0_i32 = arith.constant 0 : i32
    %c0_i32_0 = arith.constant 0 : i32
    %c0_i32_1 = arith.constant 0 : i32
    return %c0_i32, %c0_i32_0 : i32, i32
  }
  func.func @transform_7(%arg0: i32, %arg1: i32) -> (i32, i32) {
    %c0_i32 = arith.constant 0 : i32
    %c0_i32_0 = arith.constant 0 : i32
    %c0_i32_1 = arith.constant 0 : i32
    return %c0_i32, %c0_i32_0 : i32, i32
  }
  func.func @transform_8(%arg0: i32, %arg1: i32) -> (i32, i32) {
    %c0_i32 = arith.constant 0 : i32
    %c0_i32_0 = arith.constant 0 : i32
    %c0_i32_1 = arith.constant 0 : i32
    return %c0_i32, %c0_i32_0 : i32, i32
  }
  func.func @transform_9(%arg0: i32, %arg1: i32) -> (i32, i32) {
    %c0_i32 = arith.constant 0 : i32
    %c0_i32_0 = arith.constant 0 : i32
    %c0_i32_1 = arith.constant 0 : i32
    return %c0_i32, %c0_i32_0 : i32, i32
  }
  func.func @transform_10(%arg0: i32, %arg1: i32) -> (i32, i32) {
    %c0_i32 = arith.constant 0 : i32
    %c0_i32_0 = arith.constant 0 : i32
    %c0_i32_1 = arith.constant 0 : i32
    return %c0_i32, %c0_i32_0 : i32, i32
  }
  func.func @transform_11(%arg0: i32, %arg1: i32) -> (i32, i32) {
    %c0_i32 = arith.constant 0 : i32
    %c0_i32_0 = arith.constant 0 : i32
    %c0_i32_1 = arith.constant 0 : i32
    return %c0_i32, %c0_i32_0 : i32, i32
  }
  func.func @transform_12(%arg0: i32, %arg1: i32) -> (i32, i32) {
    %c0_i32 = arith.constant 0 : i32
    %c0_i32_0 = arith.constant 0 : i32
    %c0_i32_1 = arith.constant 0 : i32
    return %c0_i32, %c0_i32_0 : i32, i32
  }
  func.func @transform_13(%arg0: i32, %arg1: i32) -> (i32, i32) {
    %c0_i32 = arith.constant 0 : i32
    %c0_i32_0 = arith.constant 0 : i32
    %c0_i32_1 = arith.constant 0 : i32
    return %c0_i32, %c0_i32_0 : i32, i32
  }
  func.func @transform_14(%arg0: i32, %arg1: i32) -> (i32, i32) {
    %c0_i32 = arith.constant 0 : i32
    %c0_i32_0 = arith.constant 0 : i32
    %c0_i32_1 = arith.constant 0 : i32
    return %c0_i32, %c0_i32_0 : i32, i32
  }
  func.func @transform_15(%arg0: i32, %arg1: i32) -> (i32, i32) {
    %c0_i32 = arith.constant 0 : i32
    %c0_i32_0 = arith.constant 0 : i32
    %c0_i32_1 = arith.constant 0 : i32
    return %c0_i32, %c0_i32_0 : i32, i32
  }
  func.func @transform_16(%arg0: i32, %arg1: i32) -> (i32, i32, i32) {
    %c0_i32 = arith.constant 0 : i32
    %c0_i32_0 = arith.constant 0 : i32
    return %arg0, %arg1, %c0_i32 : i32, i32, i32
  }
}

</mosaic_0001>

<bundles_post_ra>
// kernel: tpu_custom_call.1
= control target key start
LH: loop header
LB: loop body
LE: loop exit
PB: predicated region body
PF: predicated region fallthrough
CT: control target
= control target key end

     0   :  { %s3465_s0 = inlined_call_operand.hbm [shape: f32[2,8,128], index: 0, kind: input, shape index: {}]   ;;  %s3466_s1 = inlined_call_operand.hbm [shape: f32[2,8,128], index: 1, kind: input, shape index: {}]   ;;  %s3467_s2 = inlined_call_operand.vmem [shape: f32[1,128], index: 2, kind: input, shape index: {}]   ;;  %s3468_s3 = inlined_call_operand.vmem [shape: f32[1,128], index: 3, kind: input, shape index: {}]   ;;  %s3469_s4 = inlined_call_operand.vmem [shape: f32[1,128], index: 4, kind: input, shape index: {}]   ;;  %s3470_s5 = inlined_call_operand.vmem [shape: f32[1,128], index: 5, kind: input, shape index: {}]   ;;  %s3471_s6 = inlined_call_operand.hbm [shape: bf16[128,128], index: 6, kind: input, shape index: {}]   ;;  %s3472_s7 = inlined_call_operand.hbm [shape: bf16[128,256], index: 7, kind: input, shape index: {}]   ;;  %s3473_s8 = inlined_call_operand.hbm [shape: bf16[128,128], index: 8, kind: input, shape index: {}]   ;;  %s3474_s9 = inlined_call_operand.vmem [shape: f32[1,128], index: 9, kind: input, shape index: {}]   ;;  %s3475_s10 = inlined_call_operand.vmem [shape: f32[1,128], index: 10, kind: input, shape index: {}]   ;;  %s3476_s11 = inlined_call_operand.vmem [shape: f32[1,128], index: 11, kind: input, shape index: {}]   ;;  %s3477_s12 = inlined_call_operand.hbm [shape: bf16[128,512], index: 12, kind: input, shape index: {}]   ;;  %s3478_s13 = inlined_call_operand.vmem [shape: f32[1,512], index: 13, kind: input, shape index: {}]   ;;  %s3479_s14 = inlined_call_operand.hbm [shape: bf16[512,128], index: 14, kind: input, shape index: {}]   ;;  %s3480_s15 = inlined_call_operand.vmem [shape: f32[1,128], index: 15, kind: input, shape index: {}]   ;;  %s3481_s16 = inlined_call_operand.hbm [shape: f32[2,8,128], index: 16, kind: output, shape index: {}]  }
   0x1   :  { %3490 = sst [smem:[#allocation29_spill]] %s3465_s0 }
   0x2   :  { %3491 = sst [smem:[#allocation30_spill]] %s3471_s6 }
   0x3   :  { %3492 = sst [smem:[#allocation31_spill]] %s3472_s7 }
   0x4   :  { %3493 = sst [smem:[#allocation32_spill]] %s3473_s8 }
   0x5   :  { %3494 = sst [smem:[#allocation33_spill]] %s3475_s10 }
   0x6   :  { %3495 = sst [smem:[#allocation34_spill]] %s3476_s11 }
   0x7   :  { %3496 = sst [smem:[#allocation35_spill]] %s3477_s12 }
   0x8   :  { %3497 = sst [smem:[#allocation36_spill]] %s3478_s13 }
   0x9   :  { %3498 = sst [smem:[#allocation37_spill]] %s3479_s14 }
   0xa   :  { %3499 = sst [smem:[#allocation38_spill]] %s3480_s15 }
   0xb   :  { %3500 = sst [smem:[#allocation39_spill]] %s3481_s16 }
   0xc   :  { %21 = vsyncpa [#allocation7], 0 }
   0xd   :  { %23 = vsyncpa [#allocation7 + $0x1], 0 }
   0xe   :  { %24 = vsyncpa [#allocation10], 0 }
   0xf   :  { %26 = vsyncpa [#allocation10 + $0x1], 0 }
  0x10   :  { %27 = vsyncpa [#allocation13], 0 }
  0x11   :  { %28 = vsyncpa [#allocation16], 0 }
  0x12   :  { %29 = vsyncpa [#allocation8], 0 }
  0x13   :  { %31 = vsyncpa [#allocation8 + $0x1], 0  ;;  %s3123_s21 = smov 0   ;;  %s3125_s22 = smov 0  }
  0x14   :  { %s3127_s23 = smov 0   ;;  %s3129_s24 = smov 0  }
  0x15   :  { %s3131_s25 = smov 0   ;;  %s3133_s26 = smov 0  }
  0x16 LB: > { %3501 = sst [smem:[#allocation25_spill]] %s3010_s24  ;;  %s3154_s27 = sadd.s32 4294967295, %s3018_s26   ;;  %s3018_s26 = sphi %s3133_s26, %s37_s26   ;;  %s3014_s25 = sphi %s3131_s25, %s3536_s25   ;;  %s3010_s24 = sphi %s3129_s24, %s3535_s24   ;;  %s3006_s23 = sphi %s3127_s23, %s3539_s23   ;;  %s3002_s22 = sphi %s3125_s22, %s3538_s22   ;;  %s2998_s21 = sphi %s3123_s21, %s3537_s21  }
  0x17   : > { %3502 = sst [smem:[#allocation26_spill]] %s3014_s25  ;;  %p2194_p0 = scmp.ge.s32.totalorder %s3018_s26, 1 }
  0x18   : > { %p3489_p1 = scmp.eq.s32.totalorder %s3154_s27, 0  ;;  %p430_p2 = scmp.lt.s32.totalorder %s3018_s26, 3 }
  0x19   : > { %s3020_s29 = smov [#allocation11]   ;;  %s3021_s17 = smov [#allocation12]  }
  0x1a   : > { %p3159_p3 = pnand %p2194_p0, %p430_p2  ;;  %s454_s30 = sshll.u32 %s3020_s29, 4  ;;  %s455_s30 = int_to_ptr.vmem [resolvable:$true] %s454_s30 }
  0x1b   : > { %s467_s18 = sshll.u32 %s3021_s17, 4  ;;  %s2747_s20 = scalar_lea.vmem %s455_s30, 1024  ;;  %s468_s18 = int_to_ptr.vmem [resolvable:$true] %s467_s18 }
  0x1c   : > { %p2492_p4 = pneg %p3159_p3  ;;  %p2748_p8 = scmp.ne.s32.totalorder %s455_s30, %s2747_s20 }
  0x1d   : > { %p2755_p11 = scmp.lt.s32.totalorder %s455_s30, %s455_s30  ;;  %p2756_p12 = scmp.lt.s32.totalorder %s2747_s20, %s2747_s20 }
  0x1e   : > { %p3168_p6 = pnand %p2492_p4, %p3489_p1 }
  0x1f   : > { %p2757_p13 = por %p2756_p12, %p2755_p11 }
  0x20   : > { %p3174_p7 = pneg %p3168_p6 }
  0x22   : > { %p2750_p9 = pnand %p2748_p8, %p3174_p7 }
  0x24   : > { %p2751_p10 = pneg %p2750_p9 }
  0x26   : > { %p2758_p0 = pnand %p2757_p13, %p2751_p10 }
  0x28   : > { %2761 = shalt.err (!%p2758_p0)
}
  0x29   : > { %s3483_s29 = smov 64   ;;  %s3485_s17 = smov 4  }
  0x2a   : > { %s3506_s6 = sld [smem:[#allocation30_spill]]  ;;  %s2773_s24 = scalar_lea.vmem %s468_s18, 2048 }
  0x2b   : > { %p2774_p2 = scmp.ne.s32.totalorder %s468_s18, %s2773_s24  ;;  %p2781_p9 = scmp.lt.s32.totalorder %s468_s18, %s468_s18 }
  0x2c   : > { %p2782_p10 = scmp.lt.s32.totalorder %s2773_s24, %s2773_s24 }
  0x2d   : > { %p2776_p4 = pnand %p2774_p2, %p3174_p7 }
  0x2e   : > { %p2783_p11 = por %p2782_p10, %p2781_p9 }
  0x2f   : > { %p2777_p8 = pneg %p2776_p4 }
  0x30   : > { %2495 = dma.hbm_to_vmem [thread:$0]  (!%p3168_p6), %s3506_s6, 1024, %s455_s30, [#allocation10], %s3483_s29, %s3483_s29, %s3485_s17  }
  0x31   : > { %p2784_p12 = pnand %p2783_p11, %p2777_p8 }
  0x33   : > { %2787 = shalt.err (!%p2784_p12)
}
  0x34   : > { %s3024_s20 = smov 128   ;;  %s3025_s13 = smov 8  }
  0x35   : > { %s3507_s7 = sld [smem:[#allocation31_spill]]  ;;  %s3026_s15 = smov [#allocation15]  }
  0x36   : > { %s502_s16 = sshll.u32 %s3026_s15, 4  ;;  %s503_s16 = int_to_ptr.vmem [resolvable:$true] %s502_s16 }
  0x37   : > { %s2799_s30 = scalar_lea.vmem %s503_s16, 4096  ;;  %p2807_p4 = scmp.lt.s32.totalorder %s503_s16, %s503_s16 }
  0x38   : > { %p2800_p13 = scmp.ne.s32.totalorder %s503_s16, %s2799_s30  ;;  %p2808_p8 = scmp.lt.s32.totalorder %s2799_s30, %s2799_s30 }
  0x3a   : > { %p2802_p0 = pnand %p2800_p13, %p3174_p7  ;;  %p2809_p9 = por %p2808_p8, %p2807_p4 }
  0x3b   : > { %2498 = dma.hbm_to_vmem [thread:$0]  (!%p3168_p6), %s3507_s7, 2048, %s468_s18, [#allocation13], %s3024_s20, %s3024_s20, %s3025_s13  }
  0x3c   : > { %p2803_p2 = pneg %p2802_p0 }
  0x3e   : > { %p2810_p10 = pnand %p2809_p9, %p2803_p2 }
  0x40   : > { %2813 = shalt.err (!%p2810_p10)
}
  0x41   : > { %s3027_s24 = smov 256   ;;  %s3028_s29 = smov 16  }
  0x42   : > { %s3508_s12 = sld [smem:[#allocation35_spill]]  ;;  %s3029_s13 = smov [#allocation14]  }
  0x43   : > { %s480_s18 = sshll.u32 %s3029_s13, 4  ;;  %s3030_s20 = smov [#allocation17]   ;;  %s481_s18 = int_to_ptr.vmem [resolvable:$true] %s480_s18 }
  0x44   : > { %s518_s15 = sshll.u32 %s3030_s20, 4  ;;  %s2825_s17 = scalar_lea.vmem %s481_s18, 1024  ;;  %s519_s15 = int_to_ptr.vmem [resolvable:$true] %s518_s15 }
  0x45   : > { %p2826_p11 = scmp.ne.s32.totalorder %s481_s18, %s2825_s17  ;;  %p2833_p0 = scmp.lt.s32.totalorder %s481_s18, %s481_s18 }
  0x46   : > { %p2834_p2 = scmp.lt.s32.totalorder %s2825_s17, %s2825_s17 }
  0x47   : > { %p2828_p12 = pnand %p2826_p11, %p3174_p7 }
  0x48   : > { %2504 = dma.hbm_to_vmem [thread:$0]  (!%p3168_p6), %s3508_s12, 4096, %s503_s16, [#allocation16], %s3027_s24, %s3027_s24, %s3028_s29  }
  0x49   : > { %p2829_p13 = pneg %p2828_p12  ;;  %p2835_p4 = por %p2834_p2, %p2833_p0 }
  0x4b   : > { %p2836_p8 = pnand %p2835_p4, %p2829_p13 }
  0x4d   : > { %2839 = shalt.err (!%p2836_p8)
}
  0x4e   : > { %s3509_s30 = smov 4   ;;  %s3510_s10 = smov 64  }
  0x4f   : > { %s3511_s8 = sld [smem:[#allocation32_spill]]  ;;  %s2851_s24 = scalar_lea.vmem %s519_s15, 4096 }
  0x50   : > { %p2852_p9 = scmp.ne.s32.totalorder %s519_s15, %s2851_s24  ;;  %p2859_p12 = scmp.lt.s32.totalorder %s519_s15, %s519_s15 }
  0x51   : > { %p2860_p0 = scmp.lt.s32.totalorder %s2851_s24, %s2851_s24 }
  0x52   : > { %p2854_p10 = pnand %p2852_p9, %p3174_p7 }
  0x53   : > { %p2861_p13 = por %p2860_p0, %p2859_p12 }
  0x54   : > { %p2855_p11 = pneg %p2854_p10 }
  0x55   : > { %2501 = dma.hbm_to_vmem [thread:$0]  (!%p3168_p6), %s3511_s8, 1024, %s481_s18, [#allocation13], %s3510_s10, %s3510_s10, %s3509_s30  }
  0x56   : > { %p2862_p2 = pnand %p2861_p13, %p2855_p11 }
  0x58   : > { %2865 = shalt.err (!%p2862_p2)
}
  0x59   : > { %s3512_s14 = sld [smem:[#allocation37_spill]]  ;;  %s2193_s0 = sadd.s32 4294967294, %s3018_s26  }
  0x5a   : > { %s49_s19 = sadd.s32 1, %s3014_s25  ;;  %s58_s13 = sadd.s32 1, %s3006_s23 }
  0x5b   : > { %p51_p7 = scmp.ge.s32.totalorder %s49_s19, 2  ;;  %p65_p4 = scmp.ne.s32.totalorder %s3006_s23, %s3002_s22 }
  0x5c   : > { %p66_p8 = scmp.eq.s32.totalorder %s3018_s26, 0  ;;  %p71_p9 = scmp.ne.s32.totalorder %s3002_s22, %s2998_s21 }
  0x5d   : > { %s3541_s19 = smov (%p51_p7, %s49_s19), 0  ;;  %p417_p11 = scmp.eq.s32.totalorder %s3154_s27, 1 }
  0x5e   : > { %3513 = sst [smem:[#allocation27_spill]] %s3541_s19  ;;  %p3232_p10 = por %p66_p8, %p65_p4 }
  0x5f   : > { %2507 = dma.hbm_to_vmem [thread:$0]  (!%p3168_p6), %s3512_s14, 4096, %s519_s15, [#allocation16], %s3510_s10, %s3510_s10, %s3509_s30  }
  0x60   : > { %p3238_p6 = por %p3489_p1, %p71_p9  ;;  %s53_s15 = ssub.s32 %s3014_s25, %s3541_s19 }
  0x61   : > { %p56_p12 = scmp.eq.s32.totalorder %s53_s15, 0  ;;  %p423_p0 = scmp.eq.s32.totalorder %s2193_s0, 1 }
  0x62   : > { %p3245_p13 = por %p417_p11, %p65_p4  ;;  %p2524_p2 = scmp.lt.s32.totalorder %s3018_s26, 2 }
  0x63   : > { %s3251_s10 = scalar_select %p56_p12, %s3006_s23, %s58_s13  }
  0x64   : > { %p3253_p7 = por %p423_p0, %p71_p9  ;;  %s535_s16 = sand.u32 1, %s3006_s23  }
  0x65   : > { %3517 = sst [smem:[#allocation28_spill]] %s3251_s10  ;;  %s2201_s24 = sshll.u32 %s535_s16, 3 }
  0x66   : > { %s2202_s17 = sshll.u32 %s3014_s25, 7  ;;  %s3519_s7 = sld [smem:[#allocation29_spill]] }
  0x67   : > { %s539_s15 = scalar_lea.vmem [#allocation6], %s2201_s24  ;;  %p3264_p4 = pnand %p2524_p2, %p3232_p10 }
  0x68   : > { %s547_s0 = sshll.u32 %s539_s15, 4  ;;  %s3271_s19 = scalar_lea.hbm %s3466_s1, %s2202_s17  ;;  %s548_s0 = int_to_ptr.vmem [resolvable:$true] %s547_s0 }
  0x69   : > { %s554_s25 = sand.u32 1, %s3018_s26   ;;  %s536_s10 = scalar_lea.sflag [#allocation7], %s535_s16 }
  0x6a   : > { %p2868_p8 = pneg %p3264_p4  ;;  %s2879_s6 = scalar_lea.vmem %s548_s0, 128 }
  0x6b   : > { %p2880_p9 = scmp.ne.s32.totalorder %s548_s0, %s2879_s6 }
  0x6c   : > { %s545_s8 = scalar_lea.hbm %s3519_s7, %s2202_s17  ;;  %s3031_s7 = smov [#allocation6]  }
  0x6d   : > { %p2882_p11 = pnand %p2880_p9, %p2868_p8  ;;  %s2884_s18 = sshll.u32 %s3031_s7, 4  ;;  %s2885_s18 = int_to_ptr.vmem [resolvable:$false] %s2884_s18 }
  0x6e   : > { %s2886_s11 = scalar_lea.vmem %s2885_s18, 256  ;;  %p2887_p12 = scmp.lt.s32.totalorder %s548_s0, %s2885_s18 }
  0x6f   : > { %p2883_p10 = pneg %p2882_p11  ;;  %p2888_p0 = scmp.lt.s32.totalorder %s2886_s11, %s2879_s6 }
  0x71   : > { %p2889_p2 = por %p2888_p0, %p2887_p12 }
  0x73   : > { %p2890_p5 = pnand %p2889_p2, %p2883_p10 }
  0x75   : > { %2893 = shalt.err (!%p2890_p5)
}
  0x76   : > { %2511 = dma.hbm_to_vmem [thread:$0]  (!%p3264_p4), %s545_s8, 128, %s548_s0, %s536_s10  }
  0x77   : > { %s558_s14 = scalar_lea.vmem [#allocation9], %s2201_s24  ;;  %s555_s17 = scalar_lea.sflag [#allocation10], %s554_s25 }
  0x78   : > { %s565_s16 = sshll.u32 %s558_s14, 4  ;;  %s3032_s13 = smov [#allocation9]   ;;  %s566_s16 = int_to_ptr.vmem [resolvable:$true] %s565_s16 }
  0x79   : > { %s2907_s15 = scalar_lea.vmem %s566_s16, 128  ;;  %s2912_s7 = sshll.u32 %s3032_s13, 4  ;;  %s2913_s7 = int_to_ptr.vmem [resolvable:$false] %s2912_s7 }
  0x7a   : > { %p2908_p9 = scmp.ne.s32.totalorder %s566_s16, %s2907_s15  ;;  %s2914_s6 = scalar_lea.vmem %s2913_s7, 256 }
  0x7b   : > { %p2915_p10 = scmp.lt.s32.totalorder %s566_s16, %s2913_s7  ;;  %p2916_p5 = scmp.lt.s32.totalorder %s2914_s6, %s2907_s15 }
  0x7c   : > { %p2910_p11 = pnand %p2908_p9, %p2868_p8 }
  0x7d   : > { %p2917_p12 = por %p2916_p5, %p2915_p10 }
  0x7e   : > { %p2911_p1 = pneg %p2910_p11 }
  0x80   : > { %p2918_p0 = pnand %p2917_p12, %p2911_p1 }
  0x82   : > { %2921 = shalt.err (!%p2918_p0)
}
  0x83   : > { %2514 = dma.hbm_to_vmem [thread:$0]  (!%p3264_p4), %s3271_s19, 128, %s566_s16, %s555_s17  }
  0x84   : > { %574 = sbr.rel (%p3159_p3) target bundleno = 2551 (0x9f7), region = 84  ;;  %s3290_s8 = sand.u32 (!%p3159_p3), 1, %s3002_s22  }
  0x85   : > { %s3293_s25 = sshll.u32 (!%p3159_p3), %s3290_s8, 3  ;;  %s577_s10 = scalar_lea.sflag (!%p3159_p3), [#allocation7], %s3290_s8 }
  0x86   : > { %s580_s24 = scalar_lea.vmem (!%p3159_p3), [#allocation6], %s3293_s25 }
  0x89   : > { %2973 = dma.done.wait (%p3238_p6), %s577_s10, 128  }
  0x8a   : > { %2975 = vsyncadd (%p3238_p6), %s577_s10, 4294967168  ;;  %s585_s12 = sand.u32 1, %s3154_s27   ;;  %s589_s19 = scalar_lea.vmem [#allocation9], %s3293_s25 }
  0x8b   : > { %s586_s28 = scalar_lea.sflag [#allocation10], %s585_s12 }
  0x8c   : > { %2977 = dma.done.wait (%p3238_p6), %s586_s28, 128  }
  0x8d   : > { %2979 = vsyncadd (%p3238_p6), %s586_s28, 4294967168  ;;  %p3521_p1 = scmp.eq.s32.totalorder %s3154_s27, 0 }
  0x8f   : > { %2981 = dma.done.wait (%p3521_p1), [#allocation10], 1024   ;;  %p3522_p3 = pmov %p3521_p1 }
  0x90   : > { %p3523_p4 = pmov %p3521_p1 }
  0x91   : > { %2983 = vsyncadd (%p3522_p3), [#allocation10], 4294966272 }
  0x92   : > { %2985 = dma.done.wait (%p3523_p4), [#allocation13], 3072   ;;  %p3524_p8 = pmov %p3521_p1 }
  0x93   : > { %p3525_p2 = pmov %p3521_p1 }
  0x94   : > { %2987 = vsyncadd (%p3524_p8), [#allocation13], 4294964224 }
  0x95   : > { %2989 = dma.done.wait (%p3525_p2), [#allocation16], 8192   ;;  %p3526_p9 = pmov %p3521_p1 }
  0x96   : > { %v665_v0 = vld [vmem:[%s589_s19] sm:$0xff]  ;;  %v3319_v1 = vld [vmem:[%s580_s24] sm:$0xff]  ;;  %v3033_v5 = vmov 0.0   ;;  %v3034_v26 = vmov 0   ;;  %vm3035_vm0 = vmmov 0   ;;  %vm966_vm1 = vcmask 519168  }
  0x97   : > { %2991 = vsyncadd (%p3526_p9), [#allocation16], 4294959104  ;;  %697 = vadd.xlane.f32.xlu0 %v665_v0  ;;  %v2594_v2 = vld [vmem:[#allocation12 + $0x74] ss:$8 sps:$4 sm:$0xff]   ;;  %v2596_v3 = vld [vmem:[#allocation12 + $0x70] ss:$8 sps:$4 sm:$0xff]   ;;  %2402 = vmatprep.subr.bf16.mxu0 %v3033_v5 }
  0x98   : > { %v2599_v4 = vld [vmem:[#allocation11 + $0x38] sm:$0xff]   ;;  %v2597_v6 = vld [vmem:[#allocation12 + $0x64] ss:$8 sps:$4 sm:$0xff]   ;;  %v2600_v7 = vld [vmem:[#allocation12 + $0x60] ss:$8 sps:$4 sm:$0xff]   ;;  %924 = vmatprep.subr.bf16.mxu1 %v2594_v2  ;;  %956 = vmatprep.mubr.bf16.mxu1 %v3034_v26  ;;  %s3036_s15 = smov 64  }
  0x99   : > { %2403 = vmatpush3.bf16.msra.mxu0 %v2599_v4  ;;  %925 = vmatpush1.bf16.msra.mxu1 %v2596_v3  ;;  %v2601_v16 = vld [vmem:[#allocation12 + $0x54] ss:$8 sps:$4 sm:$0xff]   ;;  %v2604_v18 = vld [vmem:[#allocation12 + $0x50] ss:$8 sps:$4 sm:$0xff]   ;;  %v2605_v19 = vld [vmem:[#allocation12 + $0x44] ss:$8 sps:$4 sm:$0xff]  }
  0x9a   : > { %2404 = vmatprep.subr.bf16.mxu0 %v3033_v5  ;;  %926 = vmatprep.subr.bf16.mxu1 %v2597_v6  ;;  %v2603_v17 = vld [vmem:[#allocation11 + $0x30] sm:$0xff]   ;;  %v2607_v20 = vld [vmem:[#allocation11 + $0x28] sm:$0xff]   ;;  %v2611_v23 = vld [vmem:[#allocation11 + $0x20] sm:$0xff]   ;;  %vm1002_vm2 = vcmask 523264   ;;  %vm1123_vm3 = vcmask 1043456   ;;  %vm1095_vm4 = vcmask 64512  }
  0x9b   : > { %668 = vadd.xlane.f32.xlu0 %v3319_v1  ;;  %v2608_v21 = vld [vmem:[#allocation12 + $0x40] ss:$8 sps:$4 sm:$0xff]   ;;  %v2609_v22 = vld [vmem:[#allocation12 + $0x34] ss:$8 sps:$4 sm:$0xff]   ;;  %v2612_v24 = vld [vmem:[#allocation12 + $0x30] ss:$8 sps:$4 sm:$0xff]   ;;  %2418 = vmatprep.mubr.msk.bf16.mxu0 %vm3035_vm0, %v3033_v5 }
  0x9c   : > { %v2613_v25 = vld [vmem:[#allocation12 + $0x24] ss:$8 sps:$4 sm:$0xff]   ;;  %v2615_v27 = vld [vmem:[#allocation11 + $0x18] sm:$0xff]   ;;  %v2616_v28 = vld [vmem:[#allocation12 + $0x20] ss:$8 sps:$4 sm:$0xff]   ;;  %vm1218_vm5 = vcmask 1048064  }
  0x9d   : > { %927 = vmatpush1.bf16.msra.mxu1 %v2600_v7  ;;  %2405 = vmatpush3.bf16.msra.mxu0 %v2603_v17  ;;  %v2617_v29 = vld [vmem:[#allocation12 + $0x14] ss:$8 sps:$4 sm:$0xff]   ;;  %v2620_v31 = vld [vmem:[#allocation12 + $0x10] ss:$8 sps:$4 sm:$0xff]   ;;  %v2621_v32 = vld [vmem:[#allocation12 + $0x4] ss:$8 sps:$4 sm:$0xff]  }
  0x9e   : > { %928 = vmatprep.subr.bf16.mxu1 %v2601_v16  ;;  %2406 = vmatprep.subr.bf16.mxu0 %v3033_v5  ;;  %v2619_v30 = vld [vmem:[#allocation11 + $0x10] sm:$0xff]   ;;  %v2623_v33 = vld [vmem:[#allocation11 + $0x8] sm:$0xff]   ;;  %v2625_v35 = vld [vmem:[#allocation11] sm:$0xff]   ;;  %s3527_s24 = sld [smem:[#allocation33_spill]]  ;;  %s2028_s12 = scalar_lea.sflag [#allocation8], %s3290_s8 }
  0x9f   : > { %v2624_v34 = vld [vmem:[#allocation12] ss:$8 sps:$4 sm:$0xff]   ;;  %s3528_s19 = sld [smem:[#allocation34_spill]] }
  0xa0   : > { %v2216_v43 = vld [vmem:[%s3469_s4] ss:$0 sm:$0xff]  ;;  %s3529_s0 = sld [smem:[#allocation36_spill]] }
  0xa1   : > { %929 = vmatpush1.bf16.msra.mxu1 %v2604_v18  ;;  %2407 = vmatpush3.bf16.msra.mxu0 %v2607_v20  ;;  %v2217_v45 = vld [vmem:[%s3470_s5] ss:$0 sm:$0xff]  ;;  %s3530_s18 = sld [smem:[#allocation25_spill]] }
  0xa2   : > { %930 = vmatprep.subr.bf16.mxu1 %v2605_v19  ;;  %2408 = vmatprep.subr.bf16.mxu0 %v3033_v5  ;;  %v2214_v48 = vld [vmem:[%s3467_s2] ss:$0 sm:$0xff]  ;;  %s3531_s16 = sld [smem:[#allocation38_spill]] }
  0xa3   : > { %v2215_v51 = vld [vmem:[%s3468_s3] ss:$0 sm:$0xff]  ;;  %s3532_s10 = sld [smem:[#allocation39_spill]] }
  0xa5   : > { %931 = vmatpush1.bf16.msra.mxu1 %v2608_v21  ;;  %2409 = vmatpush3.bf16.msra.mxu0 %v2611_v23 }
  0xa6   : > { %932 = vmatprep.subr.bf16.mxu1 %v2609_v22  ;;  %2410 = vmatprep.subr.bf16.mxu0 %v3033_v5 }
  0xa7   : > { %s2326_s17 = sshll.u32 %s3530_s18, 7 }
  0xa9   : > { %933 = vmatpush1.bf16.msra.mxu1 %v2612_v24  ;;  %2411 = vmatpush3.bf16.msra.mxu0 %v2615_v27 }
  0xaa   : > { %934 = vmatprep.subr.bf16.mxu1 %v2613_v25  ;;  %2412 = vmatprep.subr.bf16.mxu0 %v3033_v5 }
  0xad   : > { %935 = vmatpush1.bf16.msra.mxu1 %v2616_v28  ;;  %2413 = vmatpush3.bf16.msra.mxu0 %v2619_v30 }
  0xae   : > { %936 = vmatprep.subr.bf16.mxu1 %v2617_v29  ;;  %2414 = vmatprep.subr.bf16.mxu0 %v3033_v5 }
  0xb1   : > { %937 = vmatpush1.bf16.msra.mxu1 %v2620_v31  ;;  %2415 = vmatpush3.bf16.msra.mxu0 %v2623_v33 }
  0xb2   : > { %938 = vmatprep.subr.bf16.mxu1 %v2621_v32  ;;  %2416 = vmatprep.subr.bf16.mxu0 %v3033_v5 }
  0xb5   : > { %939 = vmatpush1.bf16.msra.mxu1 %v2624_v34  ;;  %2417 = vmatpush3.bf16.msra.mxu0 %v2625_v35 }
  0xb6   : > { %2422 = vmatprep.subr.bf16.mxu1 %v3033_v5  ;;  %2446 = vmatprep.subr.bf16.mxu0 %v3033_v5 }
 0x120   : > { %v698_v8 = vpop.xlane.xlu0 %697 }
 0x121   : > { %v699_v9 = vmul.f32 0.0078125, %v698_v8 }
 0x123   : > { %v3324_v10 = vsub.f32 %v665_v0, %v699_v9 }
 0x124   : > { %v669_v11 = vpop.xlane.xlu0 %668 }
 0x125   : > { %v671_v12 = vmul.f32 0.0078125, %v669_v11  ;;  %v701_v13 = vmul.f32 %v3324_v10, %v3324_v10 }
 0x127   : > { %v3329_v14 = vsub.f32 %v3319_v1, %v671_v12  ;;  %702 = vadd.xlane.f32.xlu1 %v701_v13 }
 0x129   : > { %v673_v15 = vmul.f32 %v3329_v14, %v3329_v14 }
 0x12b   : > { %674 = vadd.xlane.f32.xlu1 %v673_v15 }
 0x1b0   : > { %v703_v36 = vpop.xlane.xlu1 %702 }
 0x1b1   : > { %v704_v37 = vmul.f32 0.0078125, %v703_v36 }
 0x1b3   : > { %v705_v38 = vadd.f32 1e-05, %v704_v37 }
 0x1b4   : > { %v675_v39 = vpop.xlane.xlu1 %674 }
 0x1b5   : > { %2714 = vrsqrt.f32 %v705_v38  ;;  %v676_v40 = vmul.f32 0.0078125, %v675_v39 }
 0x1b7   : > { %v677_v41 = vadd.f32 1e-05, %v676_v40 }
 0x1b9   : > { %2716 = vrsqrt.f32 %v677_v41 }
 0x1c2   : > { %v2715_v42 = vpop.eup %2714 }
 0x1c3   : > { %v707_v44 = vmul.f32 %v2715_v42, %v3324_v10 }
 0x1c5   : > { %v714_v46 = vmul.f32 %v2216_v43, %v707_v44 }
 0x1c6   : > { %v2717_v47 = vpop.eup %2716 }
 0x1c7   : > { %v721_v49 = vadd.f32 %v2217_v45, %v714_v46  ;;  %v679_v50 = vmul.f32 %v2717_v47, %v3329_v14 }
 0x1c9   : > { %v722_v52 = vpack.c.bf16 %v721_v49, %v721_v49  ;;  %v686_v53 = vmul.f32 %v2214_v48, %v679_v50  ;;  %v2626_v48 = vld [vmem:[#allocation14 + $0x38] sm:$0xff]   ;;  %v2627_v49 = vld [vmem:[#allocation14 + $0x30] sm:$0xff]   ;;  %v2628_v50 = vld [vmem:[#allocation14 + $0x28] sm:$0xff]  }
 0x1cb   : > { %957 = vmatmul.mubr.bf16.vlgmr.msra.gmra.mxu1 %v722_v52  ;;  %v693_v54 = vadd.f32 %v2215_v51, %v686_v53  ;;  %v2629_v53 = vld [vmem:[#allocation14 + $0x20] sm:$0xff]  }
 0x1cc   : > { %2424 = vmatprep.mubr.msk.bf16.mxu1 %vm3035_vm0, %v3033_v5 }
 0x1cd   : > { %v694_v55 = vpack.c.bf16 %v693_v54, %v693_v54 }
 0x1cf   : > { %2419 = vmatmul.mubr.bf16.vlgmr.msra.gmra.mxu0 %v694_v55 }
 0x1d0   : > { %2462 = vmatprep.mubr.msk.bf16.mxu0 %vm3035_vm0, %v3033_v5  ;;  %2447 = vmatpush3.bf16.msra.mxu0 %v2626_v48 }
 0x1d1   : > { %2448 = vmatprep.subr.bf16.mxu0 %v3033_v5 }
 0x1d4   : > { %2449 = vmatpush3.bf16.msra.mxu0 %v2627_v49 }
 0x1d5   : > { %2450 = vmatprep.subr.bf16.mxu0 %v3033_v5 }
 0x1d8   : > { %2451 = vmatpush3.bf16.msra.mxu0 %v2628_v50 }
 0x1d9   : > { %2452 = vmatprep.subr.bf16.mxu0 %v3033_v5 }
 0x1dc   : > { %2453 = vmatpush3.bf16.msra.mxu0 %v2629_v53 }
 0x1dd   : > { %2454 = vmatprep.subr.bf16.mxu0 %v3033_v5 }
 0x28b   : > { %v958_v56 = vpop.f32.mrf.mxu1 }
 0x28c   : > { %v968_v57 = vpack.c.bf16 %v958_v56, %v958_v56  ;;  %v2630_v56 = vld [vmem:[#allocation14 + $0x18] sm:$0xff]  }
 0x28d   : > { %v960_v58 = vpop.f32.mrf.mxu1  ;;  %2455 = vmatpush3.bf16.msra.mxu0 %v2630_v56 }
 0x28e   : > { %969 = vst.msk [vmem:[#allocation3] sm:$0xf] %vm966_vm1, %v968_v57  ;;  %v970_v59 = vpack.c.bf16 %v960_v58, %v960_v58  ;;  %983 = vrot.lane.b32.xlu0 %v968_v57, %s3036_s15  ;;  %v2631_v57 = vld [vmem:[#allocation14 + $0x10] sm:$0xff]   ;;  %2456 = vmatprep.subr.bf16.mxu0 %v3033_v5  ;;  %v2632_v58 = vld [vmem:[#allocation14 + $0x8] sm:$0xff]  }
 0x28f   : > { %v821_v60 = vpop.f32.mrf.mxu0  ;;  %v962_v61 = vpop.f32.mrf.mxu1 }
 0x290   : > { %971 = vst.msk [vmem:[#allocation4] sm:$0xf] %vm966_vm1, %v970_v59  ;;  %v827_v62 = vmul.f32 0.125, %v821_v60 }
 0x291   : > { %v2420_v63 = vpop.f32.mrf.mxu0  ;;  %v963_v0 = vpop.f32.mrf.mxu1  ;;  %2457 = vmatpush3.bf16.msra.mxu0 %v2631_v57  ;;  %v2684_v57 = vld [vmem:[#allocation17 + $0x38] sm:$0xff]  }
 0x292   : > { %v965_v2 = vpack.c.bf16 %v827_v62, %v827_v62  ;;  %2458 = vmatprep.subr.bf16.mxu0 %v3033_v5 }
 0x293   : > { %v824_v3 = vpop.f32.mrf.mxu0 }
 0x294   : > { %967 = vst.msk [vmem:[#allocation2] sm:$0xf] %vm966_vm1, %v965_v2  ;;  %975 = vrot.lane.b32.xlu1 %v965_v2, %s3036_s15 }
 0x295   : > { %v2421_v4 = vpop.f32.mrf.mxu0  ;;  %v998_v6 = vld [vmem:[#allocation3] sm:$0xf]  ;;  %2459 = vmatpush3.bf16.msra.mxu0 %v2632_v58  ;;  %v2685_v58 = vld [vmem:[#allocation17 + $0xb8] sm:$0xff]  }
 0x296   : > { %v1007_v7 = vsel %vm1002_vm2, %v998_v6, 0  ;;  %2460 = vmatprep.subr.bf16.mxu0 %v3033_v5  ;;  %v2249_v4 = vld [vmem:[%s3474_s9] ss:$0 sm:$0xff] }
 0x297   : > { %2423 = vmatpush3.bf16.xpose.msra.mxu1 %v1007_v7  ;;  %v1000_v13 = vld [vmem:[#allocation4] sm:$0xf] }
 0x298   : > { %2428 = vmatprep.subr.bf16.mxu1 %v3033_v5  ;;  %v1125_v15 = vsel %vm1123_vm3, %v1000_v13, 0  ;;  %v2637_v13 = vld [vmem:[#allocation15 + $0xe8] ss:$16 sps:$4 sm:$0xff]  }
 0x29b   : > { %v996_v8 = vld [vmem:[#allocation2] sm:$0xf] }
 0x29e   : > { %2425 = vmatmul.mubr.msk.bf16.vlgmr.msra.gmra.mxu1 %vm1002_vm2, %v996_v8 }
 0x29f   : > { %2430 = vmatprep.mubr.msk.bf16.mxu1 %vm3035_vm0, %v3033_v5 }
 0x300   : > { %v984_v9 = vpop.permute.xlu0 %983 }
 0x301   : > { %987 = vst.msk [vmem:[#allocation3 + $0x4] sm:$0xf] %vm966_vm1, %v984_v9 }
 0x306   : > { %v976_v10 = vpop.permute.xlu1 %975 }
 0x307   : > { %979 = vst.msk [vmem:[#allocation2 + $0x4] sm:$0xf] %vm966_vm1, %v976_v10 }
 0x308   : > { %v999_v11 = vld [vmem:[#allocation3 + $0x4] sm:$0xf] }
 0x309   : > { %v1053_v12 = vsel %vm1002_vm2, %v999_v11, 0  ;;  %v2634_v11 = vld [vmem:[#allocation15 + $0xe0] ss:$16 sps:$4 sm:$0xff]  }
 0x30a   : > { %2429 = vmatpush3.bf16.xpose.msra.mxu1 %v1053_v12  ;;  %v2636_v12 = vld [vmem:[#allocation15 + $0xe4] ss:$16 sps:$4 sm:$0xff]  }
 0x30b   : > { %2434 = vmatprep.subr.bf16.mxu1 %v3033_v5 }
 0x30e   : > { %v997_v14 = vld [vmem:[#allocation2 + $0x4] sm:$0xf] }
 0x311   : > { %2431 = vmatmul.mubr.msk.bf16.vlgmr.msra.gmra.mxu1 %vm1002_vm2, %v997_v14  ;;  %v2639_v14 = vld [vmem:[#allocation15 + $0xec] ss:$16 sps:$4 sm:$0xff]  }
 0x312   : > { %2435 = vmatpush3.bf16.msra.mxu1 %v1125_v15  ;;  %2436 = vmatprep.mubr.msk.bf16.mxu1 %vm3035_vm0, %v3033_v5  ;;  %v2642_v15 = vld [vmem:[#allocation15 + $0xc4] ss:$16 sps:$4 sm:$0xff]  }
 0x313   : > { %2440 = vmatprep.subr.bf16.mxu1 %v3033_v5 }
 0x35e   : > { %v1043_v16 = vpop.f32.mrf.mxu1 }
 0x35f   : > { %v1096_v17 = vsel %vm1095_vm4, %v1043_v16, -inf }
 0x360   : > { %1097 = vmax.xlane.f32.xlu1 %v1096_v17  ;;  %v2426_v18 = vpop.f32.mrf.mxu1  ;;  %v2643_v17 = vld [vmem:[#allocation15 + $0xc8] ss:$16 sps:$4 sm:$0xff]  }
 0x362   : > { %v1046_v19 = vpop.f32.mrf.mxu1 }
 0x364   : > { %v2427_v20 = vpop.f32.mrf.mxu1 }
 0x3d1   : > { %v1089_v21 = vpop.f32.mrf.mxu1 }
 0x3d2   : > { %v1099_v22 = vsel %vm1095_vm4, %v1089_v21, -inf }
 0x3d3   : > { %1100 = vmax.xlane.f32.xlu0 %v1099_v22  ;;  %v2432_v23 = vpop.f32.mrf.mxu1  ;;  %v2651_v22 = vld [vmem:[#allocation15 + $0xac] ss:$16 sps:$4 sm:$0xff]  }
 0x3d4   : > { %v2646_v23 = vld [vmem:[#allocation15 + $0xa0] ss:$16 sps:$4 sm:$0xff]  }
 0x3d5   : > { %v1092_v24 = vpop.f32.mrf.mxu1 }
 0x3d6   : > { %v2649_v24 = vld [vmem:[#allocation15 + $0xa8] ss:$16 sps:$4 sm:$0xff]  }
 0x3d7   : > { %v2433_v25 = vpop.f32.mrf.mxu1 }
 0x3d8   : > { %v2652_v25 = vld [vmem:[#allocation15 + $0x80] ss:$16 sps:$4 sm:$0xff]  }
 0x3e9   : > { %v1098_v27 = vpop.xlane.xlu1 %1097 }
 0x3ea   : > { %v1102_v28 = vsub.f32 %v1043_v16, %v1098_v27  ;;  %v2640_v16 = vld [vmem:[#allocation15 + $0xc0] ss:$16 sps:$4 sm:$0xff]   ;;  %v2654_v27 = vld [vmem:[#allocation15 + $0x84] ss:$16 sps:$4 sm:$0xff]  }
 0x3ec   : > { %v1104_v29 = vmul.f32 1.442695, %v1102_v28  ;;  %v2655_v28 = vld [vmem:[#allocation15 + $0x88] ss:$16 sps:$4 sm:$0xff]  }
 0x3ee   : > { %2718 = vpow2.f32 %v1104_v29  ;;  %v2657_v29 = vld [vmem:[#allocation15 + $0x8c] ss:$16 sps:$4 sm:$0xff]  }
 0x3fb   : > { %v2719_v30 = vpop.eup %2718 }
 0x3fc   : > { %v1108_v31 = vsel %vm1095_vm4, %v2719_v30, 0.0 }
 0x3fd   : > { %1109 = vadd.xlane.f32.xlu0 %v1108_v31  ;;  %v2663_v31 = vld [vmem:[#allocation15 + $0x6c] ss:$16 sps:$4 sm:$0xff]  }
 0x413   : > { %991 = vrot.lane.b32.xlu0 %v970_v59, %s3036_s15  ;;  %v2633_v59 = vld [vmem:[#allocation14] sm:$0xff]  }
 0x414   : > { %2461 = vmatpush3.bf16.msra.mxu0 %v2633_v59 }
 0x415   : > { %1617 = vmatprep.subr.bf16.mxu0 %v2639_v14  ;;  %v2702_v14 = vld [vmem:[#allocation17 + $0x50] sm:$0xff]  }
 0x45c   : > { %v1101_v32 = vpop.xlane.xlu0 %1100 }
 0x45d   : > { %v1103_v33 = vsub.f32 %v1089_v21, %v1101_v32  ;;  %v2648_v21 = vld [vmem:[#allocation15 + $0xa4] ss:$16 sps:$4 sm:$0xff]   ;;  %v2658_v32 = vld [vmem:[#allocation15 + $0x60] ss:$16 sps:$4 sm:$0xff]  }
 0x45f   : > { %v1106_v34 = vmul.f32 1.442695, %v1103_v33  ;;  %v2661_v33 = vld [vmem:[#allocation15 + $0x68] ss:$16 sps:$4 sm:$0xff]  }
 0x461   : > { %2720 = vpow2.f32 %v1106_v34  ;;  %v2666_v34 = vld [vmem:[#allocation15 + $0x44] ss:$16 sps:$4 sm:$0xff]  }
 0x46e   : > { %v2721_v35 = vpop.eup %2720 }
 0x46f   : > { %v1111_v36 = vsel %vm1095_vm4, %v2721_v35, 0.0 }
 0x470   : > { %1112 = vadd.xlane.f32.xlu1 %v1111_v36  ;;  %v2664_v36 = vld [vmem:[#allocation15 + $0x40] ss:$16 sps:$4 sm:$0xff]  }
 0x486   : > { %v1110_v37 = vpop.xlane.xlu0 %1109 }
 0x487   : > { %2722 = vrcp.f32 %v1110_v37  ;;  %v2667_v37 = vld [vmem:[#allocation15 + $0x48] ss:$16 sps:$4 sm:$0xff]  }
 0x48a   : > { %v992_v38 = vpop.permute.xlu0 %991 }
 0x48b   : > { %995 = vst.msk [vmem:[#allocation4 + $0x4] sm:$0xf] %vm966_vm1, %v992_v38  ;;  %v2672_v38 = vld [vmem:[#allocation15 + $0x24] ss:$16 sps:$4 sm:$0xff]  }
 0x492   : > { %v1001_v41 = vld [vmem:[#allocation4 + $0x4] sm:$0xf] }
 0x493   : > { %v1171_v43 = vsel %vm1123_vm3, %v1001_v41, 0  ;;  %v2673_v41 = vld [vmem:[#allocation15 + $0x28] ss:$16 sps:$4 sm:$0xff]  }
 0x494   : > { %v2723_v39 = vpop.eup %2722 }
 0x495   : > { %v1116_v40 = vmul.f32 %v2723_v39, %v2719_v30  ;;  %v2660_v30 = vld [vmem:[#allocation15 + $0x64] ss:$16 sps:$4 sm:$0xff]   ;;  %v2675_v39 = vld [vmem:[#allocation15 + $0x2c] ss:$16 sps:$4 sm:$0xff]  }
 0x497   : > { %v1118_v42 = vpack.c.bf16 %v1116_v40, %v1116_v40  ;;  %v2670_v40 = vld [vmem:[#allocation15 + $0x20] ss:$16 sps:$4 sm:$0xff]  }
 0x499   : > { %2437 = vmatmul.mubr.msk.bf16.vlgmr.msra.gmra.mxu1 %vm1095_vm4, %v1118_v42  ;;  %v2678_v42 = vld [vmem:[#allocation15 + $0x4] ss:$16 sps:$4 sm:$0xff]  }
 0x49a   : > { %2441 = vmatpush3.bf16.msra.mxu1 %v1171_v43  ;;  %2442 = vmatprep.mubr.msk.bf16.mxu1 %vm3035_vm0, %v3033_v5  ;;  %v2681_v43 = vld [vmem:[#allocation15 + $0xc] ss:$16 sps:$4 sm:$0xff]  }
 0x49b   : > { %1576 = vmatprep.subr.bf16.mxu1 %v2636_v12  ;;  %v2700_v12 = vld [vmem:[#allocation17 + $0x18] sm:$0xff]  }
 0x4f9   : > { %v1113_v44 = vpop.xlane.xlu1 %1112 }
 0x4fa   : > { %2724 = vrcp.f32 %v1113_v44  ;;  %v2676_v44 = vld [vmem:[#allocation15] ss:$16 sps:$4 sm:$0xff]  }
 0x507   : > { %v2725_v45 = vpop.eup %2724 }
 0x508   : > { %v1117_v46 = vmul.f32 %v2725_v45, %v2721_v35  ;;  %v2669_v35 = vld [vmem:[#allocation15 + $0x4c] ss:$16 sps:$4 sm:$0xff]   ;;  %v2679_v45 = vld [vmem:[#allocation15 + $0x8] ss:$16 sps:$4 sm:$0xff]  }
 0x50a   : > { %v1119_v47 = vpack.c.bf16 %v1117_v46, %v1117_v46  ;;  %v2682_v46 = vld [vmem:[#allocation17 + $0x78] sm:$0xff]  }
 0x50c   : > { %2443 = vmatmul.mubr.msk.bf16.vlgmr.msra.gmra.mxu1 %vm1095_vm4, %v1119_v47  ;;  %v2683_v47 = vld [vmem:[#allocation17 + $0xf8] sm:$0xff]  }
 0x50d   : > { %1608 = vmatprep.mubr.bf16.mxu1 %v3034_v26  ;;  %1577 = vmatpush1.bf16.msra.mxu1 %v2634_v11  ;;  %v2699_v11 = vld [vmem:[#allocation17 + $0xd8] sm:$0xff]  }
 0x50e   : > { %1578 = vmatprep.subr.bf16.mxu1 %v2642_v15  ;;  %v2703_v15 = vld [vmem:[#allocation17 + $0xd0] sm:$0xff]  }
 0x511   : > { %1579 = vmatpush1.bf16.msra.mxu1 %v2640_v16  ;;  %v2705_v16 = vld [vmem:[#allocation17 + $0x90] sm:$0xff]  }
 0x512   : > { %1580 = vmatprep.subr.bf16.mxu1 %v2648_v21  ;;  %v2711_v21 = vld [vmem:[#allocation17 + $0xc0] sm:$0xff]  }
 0x515   : > { %1581 = vmatpush1.bf16.msra.mxu1 %v2646_v23  ;;  %v2713_v23 = vld [vmem:[#allocation17 + $0x80] sm:$0xff]  }
 0x516   : > { %1582 = vmatprep.subr.bf16.mxu1 %v2654_v27 }
 0x519   : > { %1583 = vmatpush1.bf16.msra.mxu1 %v2652_v25 }
 0x51a   : > { %1584 = vmatprep.subr.bf16.mxu1 %v2660_v30 }
 0x51d   : > { %1585 = vmatpush1.bf16.msra.mxu1 %v2658_v32 }
 0x51e   : > { %1586 = vmatprep.subr.bf16.mxu1 %v2666_v34 }
 0x521   : > { %1587 = vmatpush1.bf16.msra.mxu1 %v2664_v36 }
 0x522   : > { %1588 = vmatprep.subr.bf16.mxu1 %v2672_v38 }
 0x525   : > { %1589 = vmatpush1.bf16.msra.mxu1 %v2670_v40 }
 0x526   : > { %1590 = vmatprep.subr.bf16.mxu1 %v2678_v42 }
 0x529   : > { %1591 = vmatpush1.bf16.msra.mxu1 %v2676_v44 }
 0x52a   : > { %2358 = vmatprep.subr.bf16.mxu1 %v2682_v46 }
 0x559   : > { %v1161_v51 = vpop.f32.mrf.mxu1 }
 0x55a   : > { %1213 = vst.msk [vmem:[#allocation5] sm:$0xff] %vm1002_vm2, %v1161_v51 }
 0x55b   : > { %v2438_v52 = vpop.f32.mrf.mxu1 }
 0x55c   : > { %v2258_v52 = vld [vmem:[%s3527_s24] ss:$0 sm:$0xff]  ;;  %s2040_s24 = scalar_lea.hbm %s3532_s10, %s2326_s17 }
 0x55d   : > { %v1164_v54 = vpop.f32.mrf.mxu1 }
 0x55e   : > { %v2259_v54 = vld [vmem:[%s3528_s19] ss:$0 sm:$0xff]  ;;  %s3037_s19 = smov [#allocation18]  }
 0x55f   : > { %v2439_v55 = vpop.f32.mrf.mxu1  ;;  %s2926_s27 = sshll.u32 %s3037_s19, 4  ;;  %s2927_s27 = int_to_ptr.vmem [resolvable:$false] %s2926_s27 }
 0x5cc   : > { %v1207_v60 = vpop.f32.mrf.mxu1 }
 0x5cd   : > { %1215 = vrot.lane.b32.xlu1 %v1207_v60, %s3036_s15  ;;  %v2686_v60 = vld [vmem:[#allocation17 + $0x70] sm:$0xff]   ;;  %s662_s15 = scalar_lea.vmem [#allocation18], %s3293_s25  ;;  %s2928_s25 = scalar_lea.vmem %s2927_s27, 256 }
 0x5ce   : > { %v2444_v61 = vpop.f32.mrf.mxu1  ;;  %s2042_s13 = sshll.u32 %s662_s15, 4  ;;  %s2043_s13 = int_to_ptr.vmem [resolvable:$true] %s2042_s13 }
 0x5cf   : > { %v2687_v61 = vld [vmem:[#allocation17 + $0xf0] sm:$0xff]   ;;  %s2922_s28 = scalar_lea.vmem %s2043_s13, 128  ;;  %p2929_p5 = scmp.lt.s32.totalorder %s2043_s13, %s2927_s27 }
 0x5d0   : > { %v1210_v62 = vpop.f32.mrf.mxu1  ;;  %p2923_p6 = scmp.ne.s32.totalorder %s2043_s13, %s2922_s28  ;;  %p2930_p12 = scmp.lt.s32.totalorder %s2928_s25, %s2922_s28 }
 0x5d1   : > { %v2688_v62 = vld [vmem:[#allocation17 + $0x30] sm:$0xff]  }
 0x5d2   : > { %v2445_v63 = vpop.f32.mrf.mxu1  ;;  %p2924_p11 = pnand %p2923_p6, %p3245_p13  ;;  %p2931_p0 = por %p2930_p12, %p2929_p5 }
 0x5d3   : > { %v2689_v63 = vld [vmem:[#allocation17 + $0xb0] sm:$0xff]  }
 0x5d4   : > { %p2925_p10 = pneg %p2924_p11 }
 0x5d6   : > { %p2932_p1 = pnand %p2931_p0, %p2925_p10 }
 0x63f   : > { %v1216_v0 = vpop.permute.xlu1 %1215 }
 0x640   : > { %1219 = vst.msk [vmem:[#allocation5] sm:$0xff] %vm1218_vm5, %v1216_v0  ;;  %v2690_v0 = vld [vmem:[#allocation17 + $0x68] sm:$0xff]  }
 0x647   : > { %v1220_v2 = vld [vmem:[#allocation5] sm:$0xff] }
 0x648   : > { %v1221_v3 = vpack.c.bf16 %v1220_v2, %v1220_v2  ;;  %v2691_v2 = vld [vmem:[#allocation17 + $0xe8] sm:$0xff]  }
 0x64a   : > { %2463 = vmatmul.mubr.bf16.vlgmr.msra.gmra.mxu0 %v1221_v3  ;;  %v2692_v3 = vld [vmem:[#allocation17 + $0x28] sm:$0xff]  }
 0x64b   : > { %1649 = vmatprep.mubr.bf16.mxu0 %v3034_v26  ;;  %v2645_v26 = vld [vmem:[#allocation15 + $0xcc] ss:$16 sps:$4 sm:$0xff]   ;;  %1618 = vmatpush1.bf16.msra.mxu0 %v2637_v13 }
 0x64c   : > { %1619 = vmatprep.subr.bf16.mxu0 %v2645_v26  ;;  %v2701_v13 = vld [vmem:[#allocation17 + $0x98] sm:$0xff]   ;;  %v2704_v26 = vld [vmem:[#allocation17 + $0x10] sm:$0xff]  }
 0x64f   : > { %1620 = vmatpush1.bf16.msra.mxu0 %v2643_v17  ;;  %v2706_v17 = vld [vmem:[#allocation17 + $0x48] sm:$0xff]  }
 0x650   : > { %1621 = vmatprep.subr.bf16.mxu0 %v2651_v22  ;;  %v2712_v22 = vld [vmem:[#allocation17] sm:$0xff]  }
 0x653   : > { %1622 = vmatpush1.bf16.msra.mxu0 %v2649_v24  ;;  %v1396_v24 = vlaneseq }
 0x654   : > { %1623 = vmatprep.subr.bf16.mxu0 %v2657_v29  ;;  %v1394_v29 = vld [vmem:[%s3529_s0] sm:$0xf] }
 0x655   : > { %v1397_v25 = vshrl.u32 %v1396_v24, 7 }
 0x657   : > { %1624 = vmatpush1.bf16.msra.mxu0 %v2655_v28  ;;  %v1398_v27 = vsub.s32 0, %v1397_v25  ;;  %v1406_v28 = vsub.s32 2, %v1397_v25  ;;  %v1402_v30 = vsub.s32 1, %v1397_v25 }
 0x658   : > { %1625 = vmatprep.subr.bf16.mxu0 %v2663_v31  ;;  %v1410_v31 = vsub.s32 3, %v1397_v25 }
 0x659   : > { %v1399_v32 = vrot.slane %v1394_v29, %v1398_v27  ;;  %v1403_v36 = vrot.slane %v1394_v29, %v1402_v30 }
 0x65b   : > { %1626 = vmatpush1.bf16.msra.mxu0 %v2661_v33  ;;  %v1407_v33 = vrot.slane %v1394_v29, %v1406_v28 }
 0x65c   : > { %1627 = vmatprep.subr.bf16.mxu0 %v2669_v35 }
 0x65f   : > { %1628 = vmatpush1.bf16.msra.mxu0 %v2667_v37  ;;  %v1411_v37 = vrot.slane %v1394_v29, %v1410_v31 }
 0x660   : > { %1629 = vmatprep.subr.bf16.mxu0 %v2675_v39 }
 0x663   : > { %1630 = vmatpush1.bf16.msra.mxu0 %v2673_v41 }
 0x664   : > { %1631 = vmatprep.subr.bf16.mxu0 %v2681_v43 }
 0x667   : > { %1632 = vmatpush1.bf16.msra.mxu0 %v2679_v45 }
 0x668   : > { %2380 = vmatprep.subr.bf16.mxu0 %v2683_v47 }
 0x70a   : > { %v1327_v5 = vpop.f32.mrf.mxu0 }
 0x70b   : > { %v1328_v6 = vadd.f32 %v2249_v4, %v1327_v5  ;;  %v2693_v4 = vld [vmem:[#allocation17 + $0xa8] sm:$0xff]   ;;  %v2694_v5 = vld [vmem:[#allocation17 + $0x60] sm:$0xff]  }
 0x70c   : > { %v2464_v7 = vpop.f32.mrf.mxu0 }
 0x70d   : > { %v3407_v8 = vadd.f32 %v1328_v6, %v3319_v1  ;;  %v2695_v6 = vld [vmem:[#allocation17 + $0xe0] sm:$0xff]  }
 0x70e   : > { %v1330_v9 = vpop.f32.mrf.mxu0  ;;  %v2696_v7 = vld [vmem:[#allocation17 + $0x20] sm:$0xff]  }
 0x70f   : > { %1336 = vadd.xlane.f32.xlu1 %v3407_v8  ;;  %v2697_v9 = vld [vmem:[#allocation17 + $0xa0] sm:$0xff]  }
 0x710   : > { %v2465_v10 = vpop.f32.mrf.mxu0 }
 0x711   : > { %v2698_v10 = vld [vmem:[#allocation17 + $0x58] sm:$0xff]  }
 0x798   : > { %v1337_v1 = vpop.xlane.xlu1 %1336 }
 0x799   : > { %v1338_v18 = vmul.f32 0.0078125, %v1337_v1  ;;  %v2707_v1 = vld [vmem:[#allocation17 + $0xc8] sm:$0xff]  }
 0x79b   : > { %v1339_v19 = vsub.f32 %v3407_v8, %v1338_v18  ;;  %v2708_v18 = vld [vmem:[#allocation17 + $0x8] sm:$0xff]  }
 0x79d   : > { %v1340_v20 = vmul.f32 %v1339_v19, %v1339_v19 }
 0x79f   : > { %1341 = vadd.xlane.f32.xlu0 %v1340_v20  ;;  %v2710_v20 = vld [vmem:[#allocation17 + $0x40] sm:$0xff]  }
 0x828   : > { %v1342_v48 = vpop.xlane.xlu0 %1341 }
 0x829   : > { %v1343_v49 = vmul.f32 0.0078125, %v1342_v48 }
 0x82b   : > { %v1344_v50 = vadd.f32 1e-05, %v1343_v49 }
 0x82d   : > { %2726 = vrsqrt.f32 %v1344_v50 }
 0x83a   : > { %v2727_v51 = vpop.eup %2726 }
 0x83b   : > { %v1346_v53 = vmul.f32 %v2727_v51, %v1339_v19  ;;  %v2709_v19 = vld [vmem:[#allocation17 + $0x88] sm:$0xff]  }
 0x83d   : > { %v1353_v55 = vmul.f32 %v2258_v52, %v1346_v53 }
 0x83f   : > { %v1360_v56 = vadd.f32 %v2259_v54, %v1353_v55 }
 0x841   : > { %v1361_v59 = vpack.c.bf16 %v1360_v56, %v1360_v56 }
 0x843   : > { %1609 = vmatmul.mubr.bf16.vlgmr.msra.gmra.mxu1 %v1361_v59  ;;  %1650 = vmatmul.mubr.bf16.vlgmr.msra.gmra.mxu0 %v1361_v59 }
 0x844   : > { %2359 = vmatpush3.bf16.msra.mxu1 %v2684_v57  ;;  %2381 = vmatpush3.bf16.msra.mxu0 %v2685_v58 }
 0x845   : > { %2360 = vmatprep.subr.bf16.mxu1 %v2686_v60  ;;  %2382 = vmatprep.subr.bf16.mxu0 %v2687_v61 }
 0x848   : > { %2361 = vmatpush3.bf16.msra.mxu1 %v2688_v62  ;;  %2383 = vmatpush3.bf16.msra.mxu0 %v2689_v63 }
 0x849   : > { %2362 = vmatprep.subr.bf16.mxu1 %v2690_v0  ;;  %2384 = vmatprep.subr.bf16.mxu0 %v2691_v2 }
 0x84c   : > { %2363 = vmatpush3.bf16.msra.mxu1 %v2692_v3  ;;  %2385 = vmatpush3.bf16.msra.mxu0 %v2693_v4 }
 0x84d   : > { %2364 = vmatprep.subr.bf16.mxu1 %v2694_v5  ;;  %2386 = vmatprep.subr.bf16.mxu0 %v2695_v6 }
 0x850   : > { %2365 = vmatpush3.bf16.msra.mxu1 %v2696_v7  ;;  %2387 = vmatpush3.bf16.msra.mxu0 %v2697_v9 }
 0x851   : > { %2366 = vmatprep.subr.bf16.mxu1 %v2698_v10  ;;  %2388 = vmatprep.subr.bf16.mxu0 %v2699_v11 }
 0x854   : > { %2367 = vmatpush3.bf16.msra.mxu1 %v2700_v12  ;;  %2389 = vmatpush3.bf16.msra.mxu0 %v2701_v13  ;;  %v2292_v12 = vld [vmem:[%s3531_s16] ss:$0 sm:$0xff] }
 0x855   : > { %2368 = vmatprep.subr.bf16.mxu1 %v2702_v14  ;;  %2390 = vmatprep.subr.bf16.mxu0 %v2703_v15 }
 0x858   : > { %2369 = vmatpush3.bf16.msra.mxu1 %v2704_v26  ;;  %2391 = vmatpush3.bf16.msra.mxu0 %v2705_v16 }
 0x859   : > { %2370 = vmatprep.subr.bf16.mxu1 %v2706_v17  ;;  %2392 = vmatprep.subr.bf16.mxu0 %v2707_v1 }
 0x85c   : > { %2371 = vmatpush3.bf16.msra.mxu1 %v2708_v18  ;;  %2393 = vmatpush3.bf16.msra.mxu0 %v2709_v19 }
 0x85d   : > { %2372 = vmatprep.subr.bf16.mxu1 %v2710_v20  ;;  %2394 = vmatprep.subr.bf16.mxu0 %v2711_v21 }
 0x860   : > { %2373 = vmatpush3.bf16.msra.mxu1 %v2712_v22  ;;  %2395 = vmatpush3.bf16.msra.mxu0 %v2713_v23 }
 0x903   : > { %v1610_v34 = vpop.f32.mrf.mxu1  ;;  %v1651_v35 = vpop.f32.mrf.mxu0 }
 0x904   : > { %v1611_v38 = vadd.f32 %v1610_v34, %v1399_v32  ;;  %v1652_v39 = vadd.f32 %v1651_v35, %v1407_v33 }
 0x905   : > { %v1612_v40 = vpop.f32.mrf.mxu1  ;;  %v1653_v41 = vpop.f32.mrf.mxu0 }
 0x906   : > { %v1662_v42 = vmul.f32 0.70710677, %v1611_v38  ;;  %v1664_v43 = vmul.f32 0.70710677, %v1652_v39  ;;  %v1613_v44 = vadd.f32 %v1612_v40, %v1403_v36  ;;  %v1654_v45 = vadd.f32 %v1653_v41, %v1411_v37 }
 0x907   : > { %v1614_v46 = vpop.f32.mrf.mxu1  ;;  %v1655_v47 = vpop.f32.mrf.mxu0  ;;  %v1658_v57 = vmul.f32 0.5, %v1611_v38  ;;  %v1660_v59 = vmul.f32 0.5, %v1652_v39 }
 0x908   : > { %2728 = verf.f32 %v1662_v42  ;;  %v1663_v48 = vmul.f32 0.70710677, %v1613_v44  ;;  %v1665_v51 = vmul.f32 0.70710677, %v1654_v45  ;;  %v1659_v60 = vmul.f32 0.5, %v1613_v44 }
 0x909   : > { %2730 = verf.f32 %v1664_v43  ;;  %v1615_v49 = vpop.f32.mrf.mxu1  ;;  %v1656_v50 = vpop.f32.mrf.mxu0  ;;  %v1661_v63 = vmul.f32 0.5, %v1654_v45 }
 0x90a   : > { %2732 = verf.f32 %v1663_v48 }
 0x90b   : > { %2734 = verf.f32 %v1665_v51 }
 0x915   : > { %v2729_v52 = vpop.eup %2728 }
 0x916   : > { %v2731_v53 = vpop.eup %2730  ;;  %v1670_v54 = vadd.f32 1.0, %v2729_v52 }
 0x917   : > { %v1672_v55 = vadd.f32 1.0, %v2731_v53  ;;  %v2733_v56 = vpop.eup %2732 }
 0x918   : > { %v2735_v58 = vpop.eup %2734  ;;  %v1671_v61 = vadd.f32 1.0, %v2733_v56  ;;  %v1674_v62 = vmul.f32 %v1670_v54, %v1658_v57 }
 0x919   : > { %v1673_v0 = vadd.f32 1.0, %v2735_v58  ;;  %v1676_v2 = vmul.f32 %v1672_v55, %v1660_v59 }
 0x91a   : > { %v1675_v3 = vmul.f32 %v1671_v61, %v1659_v60  ;;  %v1678_v6 = vpack.c.bf16 %v1674_v62, %v1674_v62 }
 0x91b   : > { %v1677_v4 = vmul.f32 %v1673_v0, %v1661_v63  ;;  %v1680_v9 = vpack.c.bf16 %v1676_v2, %v1676_v2 }
 0x91c   : > { %v1679_v5 = vpack.c.bf16 %v1675_v3, %v1675_v3 }
 0x91d   : > { %v1681_v7 = vpack.c.bf16 %v1677_v4, %v1677_v4 }
 0x91e   : > { %1977 = vmatprep.mubr.bf16.mxu1 %v1679_v5 }
 0x91f   : > { %2017 = vmatprep.mubr.bf16.mxu0 %v1681_v7  ;;  %1978 = vmatmul.mubr.bf16.vlgmr.msra.gmra.mxu1 %v1678_v6 }
 0x920   : > { %2018 = vmatmul.mubr.bf16.vlgmr.msra.gmra.mxu0 %v1680_v9 }
 0x9df   : > { %v2374_v10 = vpop.f32.mrf.mxu1 }
 0x9e0   : > { %v2396_v11 = vpop.f32.mrf.mxu0 }
 0x9e1   : > { %v2375_v13 = vpop.f32.mrf.mxu1 }
 0x9e2   : > { %v2376_v14 = vadd.f32 %v2375_v13, %v2374_v10  ;;  %v2397_v15 = vpop.f32.mrf.mxu0 }
 0x9e3   : > { %v2377_v26 = vpop.f32.mrf.mxu1  ;;  %v2398_v17 = vadd.f32 %v2397_v15, %v2396_v11 }
 0x9e4   : > { %v1980_v16 = vadd.f32 %v2376_v14, %v2292_v12  ;;  %v2399_v1 = vpop.f32.mrf.mxu0 }
 0x9e5   : > { %v2378_v18 = vpop.f32.mrf.mxu1 }
 0x9e6   : > { %v2020_v19 = vadd.f32 %v2398_v17, %v1980_v16  ;;  %v2400_v20 = vpop.f32.mrf.mxu0 }
 0x9e8   : > { %v2025_v21 = vadd.f32 %v2020_v19, %v3407_v8 }
 0x9ea   : > { %2026 = vst [vmem:[%s662_s15] sm:$0xff] %v2025_v21 }
 0x9eb   : > { %2935 = shalt.err (!%p2932_p1)
}
 0x9ec   : > { %s2936_s20 = scalar_lea.hbm %s2040_s24, 128  ;;  %s2940_s18 = scalar_lea.hbm %s3532_s10, 256 }
 0x9ed   : > { %p2937_p3 = scmp.ne.s32.totalorder %s2040_s24, %s2936_s20  ;;  %p2941_p2 = scmp.lt.s32.totalorder %s2040_s24, %s3532_s10 }
 0x9ee   : > { %p2942_p9 = scmp.lt.s32.totalorder %s2940_s18, %s2936_s20 }
 0x9ef   : > { %p2938_p4 = pnand %p2937_p3, %p3245_p13 }
 0x9f0   : > { %p2943_p6 = por %p2942_p9, %p2941_p2 }
 0x9f1   : > { %p2939_p8 = pneg %p2938_p4 }
 0x9f3   : > { %p2944_p11 = pnand %p2943_p6, %p2939_p8 }
 0x9f5   : > { %2947 = shalt.err (!%p2944_p11)
}
 0x9f6   : > { %2490 = dma.vmem_to_hbm [thread:$0]  (%p3245_p13), %s2043_s13, 128, %s2040_s24, %s2028_s12  }
 0x9f7 PF: > { %s2054_s16 = sand.u32 1, %s2998_s21   ;;  %p3533_p10 = scmp.ge.s32.totalorder %s3018_s26, 2 }
 0x9f8   : > { %s2055_s17 = scalar_lea.sflag [#allocation8], %s2054_s16 }
 0x9f9   : > { %p2516_p5 = pnand %p3533_p10, %p3253_p7 }
 0x9fb   : > { %p2517_p12 = pneg %p2516_p5 }
 0x9fd   : > { %2993 = dma.done.wait (%p2517_p12), %s2055_s17, 128  }
 0x9fe   : > { %2995 = vsyncadd (%p2517_p12), %s2055_s17, 4294967168  ;;  %s37_s26 = sadd.s32 1, %s3018_s26   ;;  %s3534_s15 = sld [smem:[#allocation28_spill]] }
 0x9ff   : > { %p34_p0 = scmp.ge.s32.totalorder %s37_s26, 4   ;;  %s3535_s24 = sld [smem:[#allocation26_spill]] }
 0xa00   : > { %s3536_s25 = sld [smem:[#allocation27_spill]]  ;;  %s3537_s21 = smov %s3002_s22 }
 0xa01   : > { %s3538_s22 = smov %s3006_s23  ;;  %36 = sbr.rel (!%p34_p0) target bundleno = 22 (0x16), region = 165 }
 0xa04   : > { %s3539_s23 = smov %s3534_s15 }
 0xa06   :  { %2060 = vsyncpa [#allocation7], 1 }
 0xa07   :  { %2062 = vsyncpa [#allocation7 + $0x1], 1 }
 0xa08   :  { %2063 = vsyncpa [#allocation10], 1 }
 0xa09   :  { %2065 = vsyncpa [#allocation10 + $0x1], 1 }
 0xa0a   :  { %2066 = vsyncpa [#allocation13], 1 }
 0xa0b   :  { %2067 = vsyncpa [#allocation16], 1 }
 0xa0c   :  { %2068 = vsyncpa [#allocation8], 1 }
 0xa0d   :  { %2070 = vsyncpa [#allocation8 + $0x1], 1 }

</bundles_post_ra>
